<compile_context>
chip_gen: v5e
topology: v5e:2x2
jax: 0.10.0
libtpu: 0.0.40
codegen_flags: <defaults>
</compile_context>

<pallas_src>
import jax
import jax.numpy as jnp
from jax.experimental import pallas as pl
from jax.experimental.pallas import tpu as pltpu

HIDDEN = 32        # hidden_size
OUTPUT_SIZE = 64   # output_size (vocab)
MAX_LENGTH = 10    # max_length
ATT = 32           # attention segment width (>= MAX_LENGTH; == HIDDEN so ATT+3H == 128)
LANE = 128         # lane width for lane-dense padded outputs / packed slabs
NEG = -1e30        # padding logit value (exp() underflows to exactly 0)

assert ATT + 3 * HIDDEN == LANE


def attn_decoder_kernel(emb_ref, h0_ref, enc_ref,
                        w_h_ref, w_e_ref, w_ca_ref, w_i_ref, w_o_ref,
                        b_i_ref, b_misc_ref, b_o_ref,
                        logp_ref, hout_ref, attn_ref):
    H, A = HIDDEN, ATT
    T = emb_ref.shape[0]

    # Weights / biases: loaded once, resident for every decode step.
    w_h = w_h_ref[...]        # (H, 128) = [attn_h | W_hh_r | W_hh_z | W_hh_n]
    w_e = w_e_ref[...]        # (H, 64)  = [attn_e | W_comb_e]
    w_ca = w_ca_ref[...]      # (H, H)   = W_comb_attn
    w_i = w_i_ref[...]        # (H, 3H)  = W_ih (r|z|n)
    w_o = w_o_ref[...]        # (H, 128) = W_out zero-padded
    b_i = b_i_ref[...]        # (1, 3H)  = b_ih + b_hh(r,z) folded
    b_misc = b_misc_ref[...]  # (1, 128) = [b_attn(-1e30 pads) | b_comb | b_hh_n | 0]
    b_attn = b_misc[:, 0:A]
    b_comb = b_misc[:, A:A + H]
    b_hh_n = b_misc[:, A + H:A + 2 * H]
    b_o = b_o_ref[...]        # (1, 128) -1e30 pads
    enc = enc_ref[...]        # (A, H) zero-padded encoder outputs

    h = h0_ref[...]           # (1, H) carried hidden state (value carry, no scratch needed)

    # Statically unrolled decode loop (T is small & known at trace time).
    for s in range(T):
        embedded = emb_ref[pl.ds(s, 1), :]                                   # (1, H)

        # One MXU dot per LHS.
        h_slab = jnp.dot(h, w_h, preferred_element_type=jnp.float32)        # (1, 128)
        e_slab = jnp.dot(embedded, w_e, preferred_element_type=jnp.float32)  # (1, 64)

        # ---- attention softmax (pads are -1e30 -> exp underflows to 0) ----
        a_logits = e_slab[:, 0:A] + h_slab[:, 0:A] + b_attn                  # (1, A)
        m = jnp.max(a_logits, axis=1, keepdims=True)
        ex = jnp.exp(a_logits - m)
        attn_w = ex / jnp.sum(ex, axis=1, keepdims=True)                     # pads == 0
        attn_applied = jnp.dot(attn_w, enc,
                               preferred_element_type=jnp.float32)           # (1, H)

        # ---- attn_combine + relu (concat-free) ----
        comb = (e_slab[:, A:A + H]
                + jnp.dot(attn_applied, w_ca, preferred_element_type=jnp.float32)
                + b_comb)
        gru_in = jnp.maximum(comb, 0.0)                                      # (1, H)

        # ---- GRU cell (PyTorch gate order r, z, n) ----
        gi = jnp.dot(gru_in, w_i, preferred_element_type=jnp.float32) + b_i  # (1, 3H)
        gh_r = h_slab[:, A:A + H]
        gh_z = h_slab[:, A + H:A + 2 * H]
        gh_n = h_slab[:, A + 2 * H:A + 3 * H]
        r = jax.nn.sigmoid(gi[:, 0:H] + gh_r)
        z = jax.nn.sigmoid(gi[:, H:2 * H] + gh_z)
        n = jnp.tanh(gi[:, 2 * H:3 * H] + r * (gh_n + b_hh_n))
        h = (1.0 - z) * n + z * h                                            # (1, H)

        # ---- output projection + log_softmax (lane-dense, pads = -1e30) ----
        o_logits = jnp.dot(h, w_o, preferred_element_type=jnp.float32) + b_o  # (1, 128)
        mo = jnp.max(o_logits, axis=1, keepdims=True)
        lse = jnp.log(jnp.sum(jnp.exp(o_logits - mo), axis=1, keepdims=True)) + mo

        logp_ref[pl.ds(s, 1), :] = o_logits - lse
        hout_ref[pl.ds(s, 1), :] = h
        attn_ref[pl.ds(s, 1), :] = attn_w


def _pad_cols(x, n, fill=0.0):
    pad = n - x.shape[-1]
    if pad == 0:
        return x
    return jnp.pad(x, ((0, 0), (0, pad)), constant_values=fill)


def attn_decoder_forward(tokens, hidden, encoder_outputs, params):
    """Run the decoder for a (teacher-forced) token sequence in one pallas_call.

    tokens: (T,) int32; hidden: (1,1,H); encoder_outputs: (MAX_LENGTH, H).
    Returns: log_probs (T, OUTPUT_SIZE), hiddens (T, H), attn_weights (T, MAX_LENGTH).
    """
    H = HIDDEN
    tokens = jnp.clip(jnp.asarray(tokens, jnp.int32), 0, OUTPUT_SIZE - 1)
    T = int(tokens.shape[0])
    h0 = hidden.reshape(1, H)

    # --- pre-gather embedding rows & pack weights at trace time ---
    emb_rows = params["emb"][tokens]                               # (T, H)

    w_attn_e = _pad_cols(params["W_attn"][:H], ATT)                # (H, 32)
    w_attn_h = _pad_cols(params["W_attn"][H:], ATT)                # (H, 32)
    w_h = jnp.concatenate([w_attn_h, params["W_hh"]], axis=1)      # (H, 128)
    w_e = jnp.concatenate([w_attn_e, params["W_comb"][:H]], axis=1)  # (H, 64)
    w_ca = params["W_comb"][H:]                                    # (H, H)
    w_i = params["W_ih"]                                           # (H, 3H)
    w_o = _pad_cols(params["W_out"], LANE)                         # (H, 128)

    b_attn = _pad_cols(params["b_attn"], ATT, fill=NEG)            # (1, 32)
    b_hh = params["b_hh"]
    b_i = params["b_ih"] + jnp.concatenate(
        [b_hh[:, :2 * H], jnp.zeros((1, H), jnp.float32)], axis=1)  # (1, 3H)
    b_misc = jnp.concatenate(
        [b_attn, params["b_comb"], b_hh[:, 2 * H:],
         jnp.zeros((1, ATT), jnp.float32)], axis=1)                 # (1, 128)
    b_o = _pad_cols(params["b_out"], LANE, fill=NEG)                # (1, 128)

    enc_pad = jnp.pad(encoder_outputs,
                      ((0, ATT - MAX_LENGTH), (0, 0)))              # (32, H)

    ins = (emb_rows, h0, enc_pad, w_h, w_e, w_ca, w_i, w_o, b_i, b_misc, b_o)
    vmem = lambda: pl.BlockSpec(memory_space=pltpu.MemorySpace.VMEM)

    logp_pad, h_steps, attn_pad = pl.pallas_call(
        attn_decoder_kernel,
        out_shape=(
            jax.ShapeDtypeStruct((T, LANE), jnp.float32),   # padded log-probs
            jax.ShapeDtypeStruct((T, H), jnp.float32),      # per-step hidden
            jax.ShapeDtypeStruct((T, ATT), jnp.float32),    # padded attn weights
        ),
        in_specs=[vmem() for _ in ins],
        out_specs=(vmem(), vmem(), vmem()),
    )(*ins)

    return (logp_pad[:, :OUTPUT_SIZE], h_steps, attn_pad[:, :MAX_LENGTH])


def attn_decoder_step(token, hidden, encoder_outputs, params):
    """Single step matching AttnDecoderRNN.forward(input, hidden, encoder_outputs)."""
    logp, hs, attn = attn_decoder_forward(
        jnp.asarray([token], jnp.int32), hidden, encoder_outputs, params)
    return logp, hs.reshape(1, 1, HIDDEN), attn


def make_params(key):
    ks = jax.random.split(key, 11)
    s = 0.1
    return {
        "emb":    s * jax.random.normal(ks[0], (OUTPUT_SIZE, HIDDEN), jnp.float32),
        # Linear weights stored (in, out) = PyTorch weight.T
        "W_attn": s * jax.random.normal(ks[1], (2 * HIDDEN, MAX_LENGTH), jnp.float32),
        "b_attn": s * jax.random.normal(ks[2], (1, MAX_LENGTH), jnp.float32),
        "W_comb": s * jax.random.normal(ks[3], (2 * HIDDEN, HIDDEN), jnp.float32),
        "b_comb": s * jax.random.normal(ks[4], (1, HIDDEN), jnp.float32),
        # GRU weights (PyTorch weight_ih_l0 is (3H, H); stored transposed)
        "W_ih":   s * jax.random.normal(ks[5], (HIDDEN, 3 * HIDDEN), jnp.float32),
        "b_ih":   s * jax.random.normal(ks[6], (1, 3 * HIDDEN), jnp.float32),
        "W_hh":   s * jax.random.normal(ks[7], (HIDDEN, 3 * HIDDEN), jnp.float32),
        "b_hh":   s * jax.random.normal(ks[8], (1, 3 * HIDDEN), jnp.float32),
        "W_out":  s * jax.random.normal(ks[9], (HIDDEN, OUTPUT_SIZE), jnp.float32),
        "b_out":  s * jax.random.normal(ks[10], (1, OUTPUT_SIZE), jnp.float32),
    }


def reference_forward(token, hidden, encoder_outputs, p):
    """Pure-JAX reference mirroring one PyTorch forward (eval mode)."""
    H = HIDDEN
    embedded = p["emb"][token][None, :]                       # (1, H)
    h = hidden[0]                                             # (1, H)
    a_logits = jnp.concatenate([embedded, h], 1) @ p["W_attn"] + p["b_attn"]
    attn_w = jax.nn.softmax(a_logits, axis=1)
    attn_applied = attn_w @ encoder_outputs
    out = jnp.concatenate([embedded, attn_applied], 1) @ p["W_comb"] + p["b_comb"]
    out = jnp.maximum(out, 0.0)
    gi = out @ p["W_ih"] + p["b_ih"]
    gh = h @ p["W_hh"] + p["b_hh"]
    r = jax.nn.sigmoid(gi[:, :H] + gh[:, :H])
    z = jax.nn.sigmoid(gi[:, H:2 * H] + gh[:, H:2 * H])
    n = jnp.tanh(gi[:, 2 * H:] + r * gh[:, 2 * H:])
    h_new = (1 - z) * n + z * h
    logits = h_new @ p["W_out"] + p["b_out"]
    logp = jax.nn.log_softmax(logits, axis=1)
    return logp, h_new[None], attn_w


def reference_decode(tokens, hidden, encoder_outputs, p):
    logps, hiddens, attns = [], [], []
    h = hidden
    for t in tokens:
        logp, h, attn = reference_forward(int(t), h, encoder_outputs, p)
        logps.append(logp)
        hiddens.append(h[0])
        attns.append(attn)
    return (jnp.concatenate(logps, 0), jnp.concatenate(hiddens, 0),
            jnp.concatenate(attns, 0))


if __name__ == "__main__":
    key = jax.random.PRNGKey(0)
    kp, kh, ke = jax.random.split(key, 3)

    params = make_params(kp)
    hidden0 = 0.1 * jax.random.normal(kh, (1, 1, HIDDEN), jnp.float32)
    encoder_outputs = 0.1 * jax.random.normal(ke, (MAX_LENGTH, HIDDEN), jnp.float32)
    tokens = jnp.array([5, 12, 63, 0, 7, 31], dtype=jnp.int32)     # teacher-forced ids
    T = tokens.shape[0]

    # ---- fused multi-step decode (one pallas_call, one kernel invocation) ----
    logp, h_steps, attn_w = attn_decoder_forward(tokens, hidden0, encoder_outputs, params)
    jax.block_until_ready((logp, h_steps, attn_w))

    assert logp.shape == (T, OUTPUT_SIZE)
    assert h_steps.shape == (T, HIDDEN)
    assert attn_w.shape == (T, MAX_LENGTH)

    r_logp, r_h, r_attn = reference_decode(tokens.tolist(), hidden0, encoder_outputs, params)
    assert jnp.allclose(logp, r_logp, atol=1e-4), "log-probs mismatch (multi-step)"
    assert jnp.allclose(h_steps, r_h, atol=1e-4), "hidden mismatch (multi-step)"
    assert jnp.allclose(attn_w, r_attn, atol=1e-4), "attn weights mismatch (multi-step)"

    # ---- single-step call, exactly the module's forward() signature/semantics ----
    s_logp, s_h, s_attn = attn_decoder_step(5, hidden0, encoder_outputs, params)
    jax.block_until_ready((s_logp, s_h, s_attn))
    r1_logp, r1_h, r1_attn = reference_forward(5, hidden0, encoder_outputs, params)
    assert s_logp.shape == (1, OUTPUT_SIZE)
    assert s_h.shape == (1, 1, HIDDEN)
    assert s_attn.shape == (1, MAX_LENGTH)
    assert jnp.allclose(s_logp, r1_logp, atol=1e-4), "log-probs mismatch (single step)"
    assert jnp.allclose(s_h, r1_h, atol=1e-4), "hidden mismatch (single step)"
    assert jnp.allclose(s_attn, r1_attn, atol=1e-4), "attn weights mismatch (single step)"

    print("KERNEL_OK")
</pallas_src>

<mosaic_0001>
module attributes {stable_mosaic.version = 11 : i64} {
  func.func @attn_decoder_kernel(%arg0: memref<6x32xf32, #tpu.memory_space<vmem>>, %arg1: memref<1x32xf32, #tpu.memory_space<vmem>>, %arg2: memref<32x32xf32, #tpu.memory_space<vmem>>, %arg3: memref<32x128xf32, #tpu.memory_space<vmem>>, %arg4: memref<32x64xf32, #tpu.memory_space<vmem>>, %arg5: memref<32x32xf32, #tpu.memory_space<vmem>>, %arg6: memref<32x96xf32, #tpu.memory_space<vmem>>, %arg7: memref<32x128xf32, #tpu.memory_space<vmem>>, %arg8: memref<1x96xf32, #tpu.memory_space<vmem>>, %arg9: memref<1x128xf32, #tpu.memory_space<vmem>>, %arg10: memref<1x128xf32, #tpu.memory_space<vmem>>, %arg11: memref<6x128xf32, #tpu.memory_space<vmem>>, %arg12: memref<6x32xf32, #tpu.memory_space<vmem>>, %arg13: memref<6x32xf32, #tpu.memory_space<vmem>>) attributes {dimension_semantics = [], scalar_prefetch = 0 : i64, scratch_operands = 0 : i64, tpu.core_type = #tpu.core_type<tc>} {
    %c0 = arith.constant 0 : index
    %c0_0 = arith.constant 0 : index
    %0 = vector.load %arg3[%c0, %c0_0] : memref<32x128xf32, #tpu.memory_space<vmem>>, vector<32x128xf32>
    %c0_1 = arith.constant 0 : index
    %c0_2 = arith.constant 0 : index
    %1 = vector.load %arg4[%c0_1, %c0_2] : memref<32x64xf32, #tpu.memory_space<vmem>>, vector<32x64xf32>
    %c0_3 = arith.constant 0 : index
    %c0_4 = arith.constant 0 : index
    %2 = vector.load %arg5[%c0_3, %c0_4] : memref<32x32xf32, #tpu.memory_space<vmem>>, vector<32x32xf32>
    %c0_5 = arith.constant 0 : index
    %c0_6 = arith.constant 0 : index
    %3 = vector.load %arg6[%c0_5, %c0_6] : memref<32x96xf32, #tpu.memory_space<vmem>>, vector<32x96xf32>
    %c0_7 = arith.constant 0 : index
    %c0_8 = arith.constant 0 : index
    %4 = vector.load %arg7[%c0_7, %c0_8] : memref<32x128xf32, #tpu.memory_space<vmem>>, vector<32x128xf32>
    %c0_9 = arith.constant 0 : index
    %c0_10 = arith.constant 0 : index
    %5 = vector.load %arg8[%c0_9, %c0_10] : memref<1x96xf32, #tpu.memory_space<vmem>>, vector<1x96xf32>
    %c0_11 = arith.constant 0 : index
    %c0_12 = arith.constant 0 : index
    %6 = vector.load %arg9[%c0_11, %c0_12] : memref<1x128xf32, #tpu.memory_space<vmem>>, vector<1x128xf32>
    %7 = vector.extract_strided_slice %6 {offsets = [0, 0], sizes = [1, 32], strides = [1, 1]} : vector<1x128xf32> to vector<1x32xf32>
    %8 = vector.extract_strided_slice %6 {offsets = [0, 32], sizes = [1, 32], strides = [1, 1]} : vector<1x128xf32> to vector<1x32xf32>
    %9 = vector.extract_strided_slice %6 {offsets = [0, 64], sizes = [1, 32], strides = [1, 1]} : vector<1x128xf32> to vector<1x32xf32>
    %c0_13 = arith.constant 0 : index
    %c0_14 = arith.constant 0 : index
    %10 = vector.load %arg10[%c0_13, %c0_14] : memref<1x128xf32, #tpu.memory_space<vmem>>, vector<1x128xf32>
    %c0_15 = arith.constant 0 : index
    %c0_16 = arith.constant 0 : index
    %11 = vector.load %arg2[%c0_15, %c0_16] : memref<32x32xf32, #tpu.memory_space<vmem>>, vector<32x32xf32>
    %c0_17 = arith.constant 0 : index
    %c0_18 = arith.constant 0 : index
    %12 = vector.load %arg1[%c0_17, %c0_18] : memref<1x32xf32, #tpu.memory_space<vmem>>, vector<1x32xf32>
    %c0_19 = arith.constant 0 : index
    %c0_20 = arith.constant 0 : index
    %13 = vector.load %arg0[%c0_19, %c0_20] : memref<6x32xf32, #tpu.memory_space<vmem>>, vector<1x32xf32>
    %cst = arith.constant dense<0.000000e+00> : vector<1x128xf32>
    %14 = tpu.matmul %12, %0, %cst {dimension_numbers = #tpu.dot_dimension_numbers<[1], [0], [0], [1], [0, 0, 1, 1], [], []>} : vector<1x32xf32>, vector<32x128xf32>, vector<1x128xf32> -> vector<1x128xf32>
    %cst_21 = arith.constant dense<0.000000e+00> : vector<1x64xf32>
    %15 = tpu.matmul %13, %1, %cst_21 {dimension_numbers = #tpu.dot_dimension_numbers<[1], [0], [0], [1], [0, 0, 1, 1], [], []>} : vector<1x32xf32>, vector<32x64xf32>, vector<1x64xf32> -> vector<1x64xf32>
    %16 = vector.extract_strided_slice %15 {offsets = [0, 0], sizes = [1, 32], strides = [1, 1]} : vector<1x64xf32> to vector<1x32xf32>
    %17 = vector.extract_strided_slice %14 {offsets = [0, 0], sizes = [1, 32], strides = [1, 1]} : vector<1x128xf32> to vector<1x32xf32>
    %18 = arith.addf %16, %17 : vector<1x32xf32>
    %19 = arith.addf %18, %7 : vector<1x32xf32>
    %cst_22 = arith.constant dense<0xFF800000> : vector<1xf32>
    %20 = vector.multi_reduction <maximumf>, %19, %cst_22 [1] : vector<1x32xf32> to vector<1xf32>
    %21 = vector.shape_cast %20 : vector<1xf32> to vector<1x1xf32>
    %22 = vector.broadcast %21 : vector<1x1xf32> to vector<1x32xf32>
    %23 = arith.subf %19, %22 : vector<1x32xf32>
    %24 = math.exp %23 : vector<1x32xf32>
    %cst_23 = arith.constant dense<0.000000e+00> : vector<1xf32>
    %25 = vector.multi_reduction <add>, %24, %cst_23 [1] : vector<1x32xf32> to vector<1xf32>
    %26 = vector.shape_cast %25 : vector<1xf32> to vector<1x1xf32>
    %27 = vector.broadcast %26 : vector<1x1xf32> to vector<1x32xf32>
    %28 = arith.divf %24, %27 : vector<1x32xf32>
    %cst_24 = arith.constant dense<0.000000e+00> : vector<1x32xf32>
    %29 = tpu.matmul %28, %11, %cst_24 {dimension_numbers = #tpu.dot_dimension_numbers<[1], [0], [0], [1], [0, 0, 1, 1], [], []>} : vector<1x32xf32>, vector<32x32xf32>, vector<1x32xf32> -> vector<1x32xf32>
    %30 = vector.extract_strided_slice %15 {offsets = [0, 32], sizes = [1, 32], strides = [1, 1]} : vector<1x64xf32> to vector<1x32xf32>
    %cst_25 = arith.constant dense<0.000000e+00> : vector<1x32xf32>
    %31 = tpu.matmul %29, %2, %cst_25 {dimension_numbers = #tpu.dot_dimension_numbers<[1], [0], [0], [1], [0, 0, 1, 1], [], []>} : vector<1x32xf32>, vector<32x32xf32>, vector<1x32xf32> -> vector<1x32xf32>
    %32 = arith.addf %30, %31 : vector<1x32xf32>
    %33 = arith.addf %32, %8 : vector<1x32xf32>
    %cst_26 = arith.constant 0.000000e+00 : f32
    %34 = vector.broadcast %cst_26 : f32 to vector<1x32xf32>
    %35 = arith.maximumf %33, %34 : vector<1x32xf32>
    %cst_27 = arith.constant dense<0.000000e+00> : vector<1x96xf32>
    %36 = tpu.matmul %35, %3, %cst_27 {dimension_numbers = #tpu.dot_dimension_numbers<[1], [0], [0], [1], [0, 0, 1, 1], [], []>} : vector<1x32xf32>, vector<32x96xf32>, vector<1x96xf32> -> vector<1x96xf32>
    %37 = arith.addf %36, %5 : vector<1x96xf32>
    %38 = vector.extract_strided_slice %14 {offsets = [0, 32], sizes = [1, 32], strides = [1, 1]} : vector<1x128xf32> to vector<1x32xf32>
    %39 = vector.extract_strided_slice %14 {offsets = [0, 64], sizes = [1, 32], strides = [1, 1]} : vector<1x128xf32> to vector<1x32xf32>
    %40 = vector.extract_strided_slice %14 {offsets = [0, 96], sizes = [1, 32], strides = [1, 1]} : vector<1x128xf32> to vector<1x32xf32>
    %41 = vector.extract_strided_slice %37 {offsets = [0, 0], sizes = [1, 32], strides = [1, 1]} : vector<1x96xf32> to vector<1x32xf32>
    %42 = arith.addf %41, %38 : vector<1x32xf32>
    %43 = arith.negf %42 : vector<1x32xf32>
    %44 = math.exp %43 : vector<1x32xf32>
    %cst_28 = arith.constant 1.000000e+00 : f32
    %45 = vector.broadcast %cst_28 : f32 to vector<1x32xf32>
    %46 = arith.addf %45, %44 : vector<1x32xf32>
    %47 = arith.divf %45, %46 : vector<1x32xf32>
    %48 = vector.extract_strided_slice %37 {offsets = [0, 32], sizes = [1, 32], strides = [1, 1]} : vector<1x96xf32> to vector<1x32xf32>
    %49 = arith.addf %48, %39 : vector<1x32xf32>
    %50 = arith.negf %49 : vector<1x32xf32>
    %51 = math.exp %50 : vector<1x32xf32>
    %cst_29 = arith.constant 1.000000e+00 : f32
    %52 = vector.broadcast %cst_29 : f32 to vector<1x32xf32>
    %53 = arith.addf %52, %51 : vector<1x32xf32>
    %54 = arith.divf %52, %53 : vector<1x32xf32>
    %55 = vector.extract_strided_slice %37 {offsets = [0, 64], sizes = [1, 32], strides = [1, 1]} : vector<1x96xf32> to vector<1x32xf32>
    %56 = arith.addf %40, %9 : vector<1x32xf32>
    %57 = arith.mulf %47, %56 : vector<1x32xf32>
    %58 = arith.addf %55, %57 : vector<1x32xf32>
    %59 = math.tanh %58 : vector<1x32xf32>
    %cst_30 = arith.constant 1.000000e+00 : f32
    %60 = vector.broadcast %cst_30 : f32 to vector<1x32xf32>
    %61 = arith.subf %60, %54 : vector<1x32xf32>
    %62 = arith.mulf %61, %59 : vector<1x32xf32>
    %63 = arith.mulf %54, %12 : vector<1x32xf32>
    %64 = arith.addf %62, %63 : vector<1x32xf32>
    %cst_31 = arith.constant dense<0.000000e+00> : vector<1x128xf32>
    %65 = tpu.matmul %64, %4, %cst_31 {dimension_numbers = #tpu.dot_dimension_numbers<[1], [0], [0], [1], [0, 0, 1, 1], [], []>} : vector<1x32xf32>, vector<32x128xf32>, vector<1x128xf32> -> vector<1x128xf32>
    %66 = arith.addf %65, %10 : vector<1x128xf32>
    %cst_32 = arith.constant dense<0xFF800000> : vector<1xf32>
    %67 = vector.multi_reduction <maximumf>, %66, %cst_32 [1] : vector<1x128xf32> to vector<1xf32>
    %68 = vector.shape_cast %67 : vector<1xf32> to vector<1x1xf32>
    %69 = vector.broadcast %68 : vector<1x1xf32> to vector<1x128xf32>
    %70 = arith.subf %66, %69 : vector<1x128xf32>
    %71 = math.exp %70 : vector<1x128xf32>
    %cst_33 = arith.constant dense<0.000000e+00> : vector<1xf32>
    %72 = vector.multi_reduction <add>, %71, %cst_33 [1] : vector<1x128xf32> to vector<1xf32>
    %73 = vector.shape_cast %72 : vector<1xf32> to vector<1x1xf32>
    %74 = math.log %73 : vector<1x1xf32>
    %75 = arith.addf %74, %68 : vector<1x1xf32>
    %76 = vector.broadcast %75 : vector<1x1xf32> to vector<1x128xf32>
    %77 = arith.subf %66, %76 : vector<1x128xf32>
    %c0_34 = arith.constant 0 : index
    %c0_35 = arith.constant 0 : index
    %78 = vector.load %arg11[%c0_34, %c0_35] : memref<6x128xf32, #tpu.memory_space<vmem>>, vector<1x128xf32>
    tpu.vector_store %arg11[%c0_34, %c0_35], %77 {strides = array<i32>} : memref<6x128xf32, #tpu.memory_space<vmem>>, vector<1x128xf32>,
    %c0_36 = arith.constant 0 : index
    %c0_37 = arith.constant 0 : index
    %79 = vector.load %arg12[%c0_36, %c0_37] : memref<6x32xf32, #tpu.memory_space<vmem>>, vector<1x32xf32>
    tpu.vector_store %arg12[%c0_36, %c0_37], %64 {strides = array<i32>} : memref<6x32xf32, #tpu.memory_space<vmem>>, vector<1x32xf32>,
    %c0_38 = arith.constant 0 : index
    %c0_39 = arith.constant 0 : index
    %80 = vector.load %arg13[%c0_38, %c0_39] : memref<6x32xf32, #tpu.memory_space<vmem>>, vector<1x32xf32>
    tpu.vector_store %arg13[%c0_38, %c0_39], %28 {strides = array<i32>} : memref<6x32xf32, #tpu.memory_space<vmem>>, vector<1x32xf32>,
    %c1 = arith.constant 1 : index
    %c0_40 = arith.constant 0 : index
    %81 = vector.load %arg0[%c1, %c0_40] : memref<6x32xf32, #tpu.memory_space<vmem>>, vector<1x32xf32>
    %cst_41 = arith.constant dense<0.000000e+00> : vector<1x128xf32>
    %82 = tpu.matmul %64, %0, %cst_41 {dimension_numbers = #tpu.dot_dimension_numbers<[1], [0], [0], [1], [0, 0, 1, 1], [], []>} : vector<1x32xf32>, vector<32x128xf32>, vector<1x128xf32> -> vector<1x128xf32>
    %cst_42 = arith.constant dense<0.000000e+00> : vector<1x64xf32>
    %83 = tpu.matmul %81, %1, %cst_42 {dimension_numbers = #tpu.dot_dimension_numbers<[1], [0], [0], [1], [0, 0, 1, 1], [], []>} : vector<1x32xf32>, vector<32x64xf32>, vector<1x64xf32> -> vector<1x64xf32>
    %84 = vector.extract_strided_slice %83 {offsets = [0, 0], sizes = [1, 32], strides = [1, 1]} : vector<1x64xf32> to vector<1x32xf32>
    %85 = vector.extract_strided_slice %82 {offsets = [0, 0], sizes = [1, 32], strides = [1, 1]} : vector<1x128xf32> to vector<1x32xf32>
    %86 = arith.addf %84, %85 : vector<1x32xf32>
    %87 = arith.addf %86, %7 : vector<1x32xf32>
    %cst_43 = arith.constant dense<0xFF800000> : vector<1xf32>
    %88 = vector.multi_reduction <maximumf>, %87, %cst_43 [1] : vector<1x32xf32> to vector<1xf32>
    %89 = vector.shape_cast %88 : vector<1xf32> to vector<1x1xf32>
    %90 = vector.broadcast %89 : vector<1x1xf32> to vector<1x32xf32>
    %91 = arith.subf %87, %90 : vector<1x32xf32>
    %92 = math.exp %91 : vector<1x32xf32>
    %cst_44 = arith.constant dense<0.000000e+00> : vector<1xf32>
    %93 = vector.multi_reduction <add>, %92, %cst_44 [1] : vector<1x32xf32> to vector<1xf32>
    %94 = vector.shape_cast %93 : vector<1xf32> to vector<1x1xf32>
    %95 = vector.broadcast %94 : vector<1x1xf32> to vector<1x32xf32>
    %96 = arith.divf %92, %95 : vector<1x32xf32>
    %cst_45 = arith.constant dense<0.000000e+00> : vector<1x32xf32>
    %97 = tpu.matmul %96, %11, %cst_45 {dimension_numbers = #tpu.dot_dimension_numbers<[1], [0], [0], [1], [0, 0, 1, 1], [], []>} : vector<1x32xf32>, vector<32x32xf32>, vector<1x32xf32> -> vector<1x32xf32>
    %98 = vector.extract_strided_slice %83 {offsets = [0, 32], sizes = [1, 32], strides = [1, 1]} : vector<1x64xf32> to vector<1x32xf32>
    %cst_46 = arith.constant dense<0.000000e+00> : vector<1x32xf32>
    %99 = tpu.matmul %97, %2, %cst_46 {dimension_numbers = #tpu.dot_dimension_numbers<[1], [0], [0], [1], [0, 0, 1, 1], [], []>} : vector<1x32xf32>, vector<32x32xf32>, vector<1x32xf32> -> vector<1x32xf32>
    %100 = arith.addf %98, %99 : vector<1x32xf32>
    %101 = arith.addf %100, %8 : vector<1x32xf32>
    %cst_47 = arith.constant 0.000000e+00 : f32
    %102 = vector.broadcast %cst_47 : f32 to vector<1x32xf32>
    %103 = arith.maximumf %101, %102 : vector<1x32xf32>
    %cst_48 = arith.constant dense<0.000000e+00> : vector<1x96xf32>
    %104 = tpu.matmul %103, %3, %cst_48 {dimension_numbers = #tpu.dot_dimension_numbers<[1], [0], [0], [1], [0, 0, 1, 1], [], []>} : vector<1x32xf32>, vector<32x96xf32>, vector<1x96xf32> -> vector<1x96xf32>
    %105 = arith.addf %104, %5 : vector<1x96xf32>
    %106 = vector.extract_strided_slice %82 {offsets = [0, 32], sizes = [1, 32], strides = [1, 1]} : vector<1x128xf32> to vector<1x32xf32>
    %107 = vector.extract_strided_slice %82 {offsets = [0, 64], sizes = [1, 32], strides = [1, 1]} : vector<1x128xf32> to vector<1x32xf32>
    %108 = vector.extract_strided_slice %82 {offsets = [0, 96], sizes = [1, 32], strides = [1, 1]} : vector<1x128xf32> to vector<1x32xf32>
    %109 = vector.extract_strided_slice %105 {offsets = [0, 0], sizes = [1, 32], strides = [1, 1]} : vector<1x96xf32> to vector<1x32xf32>
    %110 = arith.addf %109, %106 : vector<1x32xf32>
    %111 = arith.negf %110 : vector<1x32xf32>
    %112 = math.exp %111 : vector<1x32xf32>
    %cst_49 = arith.constant 1.000000e+00 : f32
    %113 = vector.broadcast %cst_49 : f32 to vector<1x32xf32>
    %114 = arith.addf %113, %112 : vector<1x32xf32>
    %115 = arith.divf %113, %114 : vector<1x32xf32>
    %116 = vector.extract_strided_slice %105 {offsets = [0, 32], sizes = [1, 32], strides = [1, 1]} : vector<1x96xf32> to vector<1x32xf32>
    %117 = arith.addf %116, %107 : vector<1x32xf32>
    %118 = arith.negf %117 : vector<1x32xf32>
    %119 = math.exp %118 : vector<1x32xf32>
    %cst_50 = arith.constant 1.000000e+00 : f32
    %120 = vector.broadcast %cst_50 : f32 to vector<1x32xf32>
    %121 = arith.addf %120, %119 : vector<1x32xf32>
    %122 = arith.divf %120, %121 : vector<1x32xf32>
    %123 = vector.extract_strided_slice %105 {offsets = [0, 64], sizes = [1, 32], strides = [1, 1]} : vector<1x96xf32> to vector<1x32xf32>
    %124 = arith.addf %108, %9 : vector<1x32xf32>
    %125 = arith.mulf %115, %124 : vector<1x32xf32>
    %126 = arith.addf %123, %125 : vector<1x32xf32>
    %127 = math.tanh %126 : vector<1x32xf32>
    %cst_51 = arith.constant 1.000000e+00 : f32
    %128 = vector.broadcast %cst_51 : f32 to vector<1x32xf32>
    %129 = arith.subf %128, %122 : vector<1x32xf32>
    %130 = arith.mulf %129, %127 : vector<1x32xf32>
    %131 = arith.mulf %122, %64 : vector<1x32xf32>
    %132 = arith.addf %130, %131 : vector<1x32xf32>
    %cst_52 = arith.constant dense<0.000000e+00> : vector<1x128xf32>
    %133 = tpu.matmul %132, %4, %cst_52 {dimension_numbers = #tpu.dot_dimension_numbers<[1], [0], [0], [1], [0, 0, 1, 1], [], []>} : vector<1x32xf32>, vector<32x128xf32>, vector<1x128xf32> -> vector<1x128xf32>
    %134 = arith.addf %133, %10 : vector<1x128xf32>
    %cst_53 = arith.constant dense<0xFF800000> : vector<1xf32>
    %135 = vector.multi_reduction <maximumf>, %134, %cst_53 [1] : vector<1x128xf32> to vector<1xf32>
    %136 = vector.shape_cast %135 : vector<1xf32> to vector<1x1xf32>
    %137 = vector.broadcast %136 : vector<1x1xf32> to vector<1x128xf32>
    %138 = arith.subf %134, %137 : vector<1x128xf32>
    %139 = math.exp %138 : vector<1x128xf32>
    %cst_54 = arith.constant dense<0.000000e+00> : vector<1xf32>
    %140 = vector.multi_reduction <add>, %139, %cst_54 [1] : vector<1x128xf32> to vector<1xf32>
    %141 = vector.shape_cast %140 : vector<1xf32> to vector<1x1xf32>
    %142 = math.log %141 : vector<1x1xf32>
    %143 = arith.addf %142, %136 : vector<1x1xf32>
    %144 = vector.broadcast %143 : vector<1x1xf32> to vector<1x128xf32>
    %145 = arith.subf %134, %144 : vector<1x128xf32>
    %c1_55 = arith.constant 1 : index
    %c0_56 = arith.constant 0 : index
    %146 = vector.load %arg11[%c1_55, %c0_56] : memref<6x128xf32, #tpu.memory_space<vmem>>, vector<1x128xf32>
    tpu.vector_store %arg11[%c1_55, %c0_56], %145 {strides = array<i32>} : memref<6x128xf32, #tpu.memory_space<vmem>>, vector<1x128xf32>,
    %c1_57 = arith.constant 1 : index
    %c0_58 = arith.constant 0 : index
    %147 = vector.load %arg12[%c1_57, %c0_58] : memref<6x32xf32, #tpu.memory_space<vmem>>, vector<1x32xf32>
    tpu.vector_store %arg12[%c1_57, %c0_58], %132 {strides = array<i32>} : memref<6x32xf32, #tpu.memory_space<vmem>>, vector<1x32xf32>,
    %c1_59 = arith.constant 1 : index
    %c0_60 = arith.constant 0 : index
    %148 = vector.load %arg13[%c1_59, %c0_60] : memref<6x32xf32, #tpu.memory_space<vmem>>, vector<1x32xf32>
    tpu.vector_store %arg13[%c1_59, %c0_60], %96 {strides = array<i32>} : memref<6x32xf32, #tpu.memory_space<vmem>>, vector<1x32xf32>,
    %c2 = arith.constant 2 : index
    %c0_61 = arith.constant 0 : index
    %149 = vector.load %arg0[%c2, %c0_61] : memref<6x32xf32, #tpu.memory_space<vmem>>, vector<1x32xf32>
    %cst_62 = arith.constant dense<0.000000e+00> : vector<1x128xf32>
    %150 = tpu.matmul %132, %0, %cst_62 {dimension_numbers = #tpu.dot_dimension_numbers<[1], [0], [0], [1], [0, 0, 1, 1], [], []>} : vector<1x32xf32>, vector<32x128xf32>, vector<1x128xf32> -> vector<1x128xf32>
    %cst_63 = arith.constant dense<0.000000e+00> : vector<1x64xf32>
    %151 = tpu.matmul %149, %1, %cst_63 {dimension_numbers = #tpu.dot_dimension_numbers<[1], [0], [0], [1], [0, 0, 1, 1], [], []>} : vector<1x32xf32>, vector<32x64xf32>, vector<1x64xf32> -> vector<1x64xf32>
    %152 = vector.extract_strided_slice %151 {offsets = [0, 0], sizes = [1, 32], strides = [1, 1]} : vector<1x64xf32> to vector<1x32xf32>
    %153 = vector.extract_strided_slice %150 {offsets = [0, 0], sizes = [1, 32], strides = [1, 1]} : vector<1x128xf32> to vector<1x32xf32>
    %154 = arith.addf %152, %153 : vector<1x32xf32>
    %155 = arith.addf %154, %7 : vector<1x32xf32>
    %cst_64 = arith.constant dense<0xFF800000> : vector<1xf32>
    %156 = vector.multi_reduction <maximumf>, %155, %cst_64 [1] : vector<1x32xf32> to vector<1xf32>
    %157 = vector.shape_cast %156 : vector<1xf32> to vector<1x1xf32>
    %158 = vector.broadcast %157 : vector<1x1xf32> to vector<1x32xf32>
    %159 = arith.subf %155, %158 : vector<1x32xf32>
    %160 = math.exp %159 : vector<1x32xf32>
    %cst_65 = arith.constant dense<0.000000e+00> : vector<1xf32>
    %161 = vector.multi_reduction <add>, %160, %cst_65 [1] : vector<1x32xf32> to vector<1xf32>
    %162 = vector.shape_cast %161 : vector<1xf32> to vector<1x1xf32>
    %163 = vector.broadcast %162 : vector<1x1xf32> to vector<1x32xf32>
    %164 = arith.divf %160, %163 : vector<1x32xf32>
    %cst_66 = arith.constant dense<0.000000e+00> : vector<1x32xf32>
    %165 = tpu.matmul %164, %11, %cst_66 {dimension_numbers = #tpu.dot_dimension_numbers<[1], [0], [0], [1], [0, 0, 1, 1], [], []>} : vector<1x32xf32>, vector<32x32xf32>, vector<1x32xf32> -> vector<1x32xf32>
    %166 = vector.extract_strided_slice %151 {offsets = [0, 32], sizes = [1, 32], strides = [1, 1]} : vector<1x64xf32> to vector<1x32xf32>
    %cst_67 = arith.constant dense<0.000000e+00> : vector<1x32xf32>
    %167 = tpu.matmul %165, %2, %cst_67 {dimension_numbers = #tpu.dot_dimension_numbers<[1], [0], [0], [1], [0, 0, 1, 1], [], []>} : vector<1x32xf32>, vector<32x32xf32>, vector<1x32xf32> -> vector<1x32xf32>
    %168 = arith.addf %166, %167 : vector<1x32xf32>
    %169 = arith.addf %168, %8 : vector<1x32xf32>
    %cst_68 = arith.constant 0.000000e+00 : f32
    %170 = vector.broadcast %cst_68 : f32 to vector<1x32xf32>
    %171 = arith.maximumf %169, %170 : vector<1x32xf32>
    %cst_69 = arith.constant dense<0.000000e+00> : vector<1x96xf32>
    %172 = tpu.matmul %171, %3, %cst_69 {dimension_numbers = #tpu.dot_dimension_numbers<[1], [0], [0], [1], [0, 0, 1, 1], [], []>} : vector<1x32xf32>, vector<32x96xf32>, vector<1x96xf32> -> vector<1x96xf32>
    %173 = arith.addf %172, %5 : vector<1x96xf32>
    %174 = vector.extract_strided_slice %150 {offsets = [0, 32], sizes = [1, 32], strides = [1, 1]} : vector<1x128xf32> to vector<1x32xf32>
    %175 = vector.extract_strided_slice %150 {offsets = [0, 64], sizes = [1, 32], strides = [1, 1]} : vector<1x128xf32> to vector<1x32xf32>
    %176 = vector.extract_strided_slice %150 {offsets = [0, 96], sizes = [1, 32], strides = [1, 1]} : vector<1x128xf32> to vector<1x32xf32>
    %177 = vector.extract_strided_slice %173 {offsets = [0, 0], sizes = [1, 32], strides = [1, 1]} : vector<1x96xf32> to vector<1x32xf32>
    %178 = arith.addf %177, %174 : vector<1x32xf32>
    %179 = arith.negf %178 : vector<1x32xf32>
    %180 = math.exp %179 : vector<1x32xf32>
    %cst_70 = arith.constant 1.000000e+00 : f32
    %181 = vector.broadcast %cst_70 : f32 to vector<1x32xf32>
    %182 = arith.addf %181, %180 : vector<1x32xf32>
    %183 = arith.divf %181, %182 : vector<1x32xf32>
    %184 = vector.extract_strided_slice %173 {offsets = [0, 32], sizes = [1, 32], strides = [1, 1]} : vector<1x96xf32> to vector<1x32xf32>
    %185 = arith.addf %184, %175 : vector<1x32xf32>
    %186 = arith.negf %185 : vector<1x32xf32>
    %187 = math.exp %186 : vector<1x32xf32>
    %cst_71 = arith.constant 1.000000e+00 : f32
    %188 = vector.broadcast %cst_71 : f32 to vector<1x32xf32>
    %189 = arith.addf %188, %187 : vector<1x32xf32>
    %190 = arith.divf %188, %189 : vector<1x32xf32>
    %191 = vector.extract_strided_slice %173 {offsets = [0, 64], sizes = [1, 32], strides = [1, 1]} : vector<1x96xf32> to vector<1x32xf32>
    %192 = arith.addf %176, %9 : vector<1x32xf32>
    %193 = arith.mulf %183, %192 : vector<1x32xf32>
    %194 = arith.addf %191, %193 : vector<1x32xf32>
    %195 = math.tanh %194 : vector<1x32xf32>
    %cst_72 = arith.constant 1.000000e+00 : f32
    %196 = vector.broadcast %cst_72 : f32 to vector<1x32xf32>
    %197 = arith.subf %196, %190 : vector<1x32xf32>
    %198 = arith.mulf %197, %195 : vector<1x32xf32>
    %199 = arith.mulf %190, %132 : vector<1x32xf32>
    %200 = arith.addf %198, %199 : vector<1x32xf32>
    %cst_73 = arith.constant dense<0.000000e+00> : vector<1x128xf32>
    %201 = tpu.matmul %200, %4, %cst_73 {dimension_numbers = #tpu.dot_dimension_numbers<[1], [0], [0], [1], [0, 0, 1, 1], [], []>} : vector<1x32xf32>, vector<32x128xf32>, vector<1x128xf32> -> vector<1x128xf32>
    %202 = arith.addf %201, %10 : vector<1x128xf32>
    %cst_74 = arith.constant dense<0xFF800000> : vector<1xf32>
    %203 = vector.multi_reduction <maximumf>, %202, %cst_74 [1] : vector<1x128xf32> to vector<1xf32>
    %204 = vector.shape_cast %203 : vector<1xf32> to vector<1x1xf32>
    %205 = vector.broadcast %204 : vector<1x1xf32> to vector<1x128xf32>
    %206 = arith.subf %202, %205 : vector<1x128xf32>
    %207 = math.exp %206 : vector<1x128xf32>
    %cst_75 = arith.constant dense<0.000000e+00> : vector<1xf32>
    %208 = vector.multi_reduction <add>, %207, %cst_75 [1] : vector<1x128xf32> to vector<1xf32>
    %209 = vector.shape_cast %208 : vector<1xf32> to vector<1x1xf32>
    %210 = math.log %209 : vector<1x1xf32>
    %211 = arith.addf %210, %204 : vector<1x1xf32>
    %212 = vector.broadcast %211 : vector<1x1xf32> to vector<1x128xf32>
    %213 = arith.subf %202, %212 : vector<1x128xf32>
    %c2_76 = arith.constant 2 : index
    %c0_77 = arith.constant 0 : index
    %214 = vector.load %arg11[%c2_76, %c0_77] : memref<6x128xf32, #tpu.memory_space<vmem>>, vector<1x128xf32>
    tpu.vector_store %arg11[%c2_76, %c0_77], %213 {strides = array<i32>} : memref<6x128xf32, #tpu.memory_space<vmem>>, vector<1x128xf32>,
    %c2_78 = arith.constant 2 : index
    %c0_79 = arith.constant 0 : index
    %215 = vector.load %arg12[%c2_78, %c0_79] : memref<6x32xf32, #tpu.memory_space<vmem>>, vector<1x32xf32>
    tpu.vector_store %arg12[%c2_78, %c0_79], %200 {strides = array<i32>} : memref<6x32xf32, #tpu.memory_space<vmem>>, vector<1x32xf32>,
    %c2_80 = arith.constant 2 : index
    %c0_81 = arith.constant 0 : index
    %216 = vector.load %arg13[%c2_80, %c0_81] : memref<6x32xf32, #tpu.memory_space<vmem>>, vector<1x32xf32>
    tpu.vector_store %arg13[%c2_80, %c0_81], %164 {strides = array<i32>} : memref<6x32xf32, #tpu.memory_space<vmem>>, vector<1x32xf32>,
    %c3 = arith.constant 3 : index
    %c0_82 = arith.constant 0 : index
    %217 = vector.load %arg0[%c3, %c0_82] : memref<6x32xf32, #tpu.memory_space<vmem>>, vector<1x32xf32>
    %cst_83 = arith.constant dense<0.000000e+00> : vector<1x128xf32>
    %218 = tpu.matmul %200, %0, %cst_83 {dimension_numbers = #tpu.dot_dimension_numbers<[1], [0], [0], [1], [0, 0, 1, 1], [], []>} : vector<1x32xf32>, vector<32x128xf32>, vector<1x128xf32> -> vector<1x128xf32>
    %cst_84 = arith.constant dense<0.000000e+00> : vector<1x64xf32>
    %219 = tpu.matmul %217, %1, %cst_84 {dimension_numbers = #tpu.dot_dimension_numbers<[1], [0], [0], [1], [0, 0, 1, 1], [], []>} : vector<1x32xf32>, vector<32x64xf32>, vector<1x64xf32> -> vector<1x64xf32>
    %220 = vector.extract_strided_slice %219 {offsets = [0, 0], sizes = [1, 32], strides = [1, 1]} : vector<1x64xf32> to vector<1x32xf32>
    %221 = vector.extract_strided_slice %218 {offsets = [0, 0], sizes = [1, 32], strides = [1, 1]} : vector<1x128xf32> to vector<1x32xf32>
    %222 = arith.addf %220, %221 : vector<1x32xf32>
    %223 = arith.addf %222, %7 : vector<1x32xf32>
    %cst_85 = arith.constant dense<0xFF800000> : vector<1xf32>
    %224 = vector.multi_reduction <maximumf>, %223, %cst_85 [1] : vector<1x32xf32> to vector<1xf32>
    %225 = vector.shape_cast %224 : vector<1xf32> to vector<1x1xf32>
    %226 = vector.broadcast %225 : vector<1x1xf32> to vector<1x32xf32>
    %227 = arith.subf %223, %226 : vector<1x32xf32>
    %228 = math.exp %227 : vector<1x32xf32>
    %cst_86 = arith.constant dense<0.000000e+00> : vector<1xf32>
    %229 = vector.multi_reduction <add>, %228, %cst_86 [1] : vector<1x32xf32> to vector<1xf32>
    %230 = vector.shape_cast %229 : vector<1xf32> to vector<1x1xf32>
    %231 = vector.broadcast %230 : vector<1x1xf32> to vector<1x32xf32>
    %232 = arith.divf %228, %231 : vector<1x32xf32>
    %cst_87 = arith.constant dense<0.000000e+00> : vector<1x32xf32>
    %233 = tpu.matmul %232, %11, %cst_87 {dimension_numbers = #tpu.dot_dimension_numbers<[1], [0], [0], [1], [0, 0, 1, 1], [], []>} : vector<1x32xf32>, vector<32x32xf32>, vector<1x32xf32> -> vector<1x32xf32>
    %234 = vector.extract_strided_slice %219 {offsets = [0, 32], sizes = [1, 32], strides = [1, 1]} : vector<1x64xf32> to vector<1x32xf32>
    %cst_88 = arith.constant dense<0.000000e+00> : vector<1x32xf32>
    %235 = tpu.matmul %233, %2, %cst_88 {dimension_numbers = #tpu.dot_dimension_numbers<[1], [0], [0], [1], [0, 0, 1, 1], [], []>} : vector<1x32xf32>, vector<32x32xf32>, vector<1x32xf32> -> vector<1x32xf32>
    %236 = arith.addf %234, %235 : vector<1x32xf32>
    %237 = arith.addf %236, %8 : vector<1x32xf32>
    %cst_89 = arith.constant 0.000000e+00 : f32
    %238 = vector.broadcast %cst_89 : f32 to vector<1x32xf32>
    %239 = arith.maximumf %237, %238 : vector<1x32xf32>
    %cst_90 = arith.constant dense<0.000000e+00> : vector<1x96xf32>
    %240 = tpu.matmul %239, %3, %cst_90 {dimension_numbers = #tpu.dot_dimension_numbers<[1], [0], [0], [1], [0, 0, 1, 1], [], []>} : vector<1x32xf32>, vector<32x96xf32>, vector<1x96xf32> -> vector<1x96xf32>
    %241 = arith.addf %240, %5 : vector<1x96xf32>
    %242 = vector.extract_strided_slice %218 {offsets = [0, 32], sizes = [1, 32], strides = [1, 1]} : vector<1x128xf32> to vector<1x32xf32>
    %243 = vector.extract_strided_slice %218 {offsets = [0, 64], sizes = [1, 32], strides = [1, 1]} : vector<1x128xf32> to vector<1x32xf32>
    %244 = vector.extract_strided_slice %218 {offsets = [0, 96], sizes = [1, 32], strides = [1, 1]} : vector<1x128xf32> to vector<1x32xf32>
    %245 = vector.extract_strided_slice %241 {offsets = [0, 0], sizes = [1, 32], strides = [1, 1]} : vector<1x96xf32> to vector<1x32xf32>
    %246 = arith.addf %245, %242 : vector<1x32xf32>
    %247 = arith.negf %246 : vector<1x32xf32>
    %248 = math.exp %247 : vector<1x32xf32>
    %cst_91 = arith.constant 1.000000e+00 : f32
    %249 = vector.broadcast %cst_91 : f32 to vector<1x32xf32>
    %250 = arith.addf %249, %248 : vector<1x32xf32>
    %251 = arith.divf %249, %250 : vector<1x32xf32>
    %252 = vector.extract_strided_slice %241 {offsets = [0, 32], sizes = [1, 32], strides = [1, 1]} : vector<1x96xf32> to vector<1x32xf32>
    %253 = arith.addf %252, %243 : vector<1x32xf32>
    %254 = arith.negf %253 : vector<1x32xf32>
    %255 = math.exp %254 : vector<1x32xf32>
    %cst_92 = arith.constant 1.000000e+00 : f32
    %256 = vector.broadcast %cst_92 : f32 to vector<1x32xf32>
    %257 = arith.addf %256, %255 : vector<1x32xf32>
    %258 = arith.divf %256, %257 : vector<1x32xf32>
    %259 = vector.extract_strided_slice %241 {offsets = [0, 64], sizes = [1, 32], strides = [1, 1]} : vector<1x96xf32> to vector<1x32xf32>
    %260 = arith.addf %244, %9 : vector<1x32xf32>
    %261 = arith.mulf %251, %260 : vector<1x32xf32>
    %262 = arith.addf %259, %261 : vector<1x32xf32>
    %263 = math.tanh %262 : vector<1x32xf32>
    %cst_93 = arith.constant 1.000000e+00 : f32
    %264 = vector.broadcast %cst_93 : f32 to vector<1x32xf32>
    %265 = arith.subf %264, %258 : vector<1x32xf32>
    %266 = arith.mulf %265, %263 : vector<1x32xf32>
    %267 = arith.mulf %258, %200 : vector<1x32xf32>
    %268 = arith.addf %266, %267 : vector<1x32xf32>
    %cst_94 = arith.constant dense<0.000000e+00> : vector<1x128xf32>
    %269 = tpu.matmul %268, %4, %cst_94 {dimension_numbers = #tpu.dot_dimension_numbers<[1], [0], [0], [1], [0, 0, 1, 1], [], []>} : vector<1x32xf32>, vector<32x128xf32>, vector<1x128xf32> -> vector<1x128xf32>
    %270 = arith.addf %269, %10 : vector<1x128xf32>
    %cst_95 = arith.constant dense<0xFF800000> : vector<1xf32>
    %271 = vector.multi_reduction <maximumf>, %270, %cst_95 [1] : vector<1x128xf32> to vector<1xf32>
    %272 = vector.shape_cast %271 : vector<1xf32> to vector<1x1xf32>
    %273 = vector.broadcast %272 : vector<1x1xf32> to vector<1x128xf32>
    %274 = arith.subf %270, %273 : vector<1x128xf32>
    %275 = math.exp %274 : vector<1x128xf32>
    %cst_96 = arith.constant dense<0.000000e+00> : vector<1xf32>
    %276 = vector.multi_reduction <add>, %275, %cst_96 [1] : vector<1x128xf32> to vector<1xf32>
    %277 = vector.shape_cast %276 : vector<1xf32> to vector<1x1xf32>
    %278 = math.log %277 : vector<1x1xf32>
    %279 = arith.addf %278, %272 : vector<1x1xf32>
    %280 = vector.broadcast %279 : vector<1x1xf32> to vector<1x128xf32>
    %281 = arith.subf %270, %280 : vector<1x128xf32>
    %c3_97 = arith.constant 3 : index
    %c0_98 = arith.constant 0 : index
    %282 = vector.load %arg11[%c3_97, %c0_98] : memref<6x128xf32, #tpu.memory_space<vmem>>, vector<1x128xf32>
    tpu.vector_store %arg11[%c3_97, %c0_98], %281 {strides = array<i32>} : memref<6x128xf32, #tpu.memory_space<vmem>>, vector<1x128xf32>,
    %c3_99 = arith.constant 3 : index
    %c0_100 = arith.constant 0 : index
    %283 = vector.load %arg12[%c3_99, %c0_100] : memref<6x32xf32, #tpu.memory_space<vmem>>, vector<1x32xf32>
    tpu.vector_store %arg12[%c3_99, %c0_100], %268 {strides = array<i32>} : memref<6x32xf32, #tpu.memory_space<vmem>>, vector<1x32xf32>,
    %c3_101 = arith.constant 3 : index
    %c0_102 = arith.constant 0 : index
    %284 = vector.load %arg13[%c3_101, %c0_102] : memref<6x32xf32, #tpu.memory_space<vmem>>, vector<1x32xf32>
    tpu.vector_store %arg13[%c3_101, %c0_102], %232 {strides = array<i32>} : memref<6x32xf32, #tpu.memory_space<vmem>>, vector<1x32xf32>,
    %c4 = arith.constant 4 : index
    %c0_103 = arith.constant 0 : index
    %285 = vector.load %arg0[%c4, %c0_103] : memref<6x32xf32, #tpu.memory_space<vmem>>, vector<1x32xf32>
    %cst_104 = arith.constant dense<0.000000e+00> : vector<1x128xf32>
    %286 = tpu.matmul %268, %0, %cst_104 {dimension_numbers = #tpu.dot_dimension_numbers<[1], [0], [0], [1], [0, 0, 1, 1], [], []>} : vector<1x32xf32>, vector<32x128xf32>, vector<1x128xf32> -> vector<1x128xf32>
    %cst_105 = arith.constant dense<0.000000e+00> : vector<1x64xf32>
    %287 = tpu.matmul %285, %1, %cst_105 {dimension_numbers = #tpu.dot_dimension_numbers<[1], [0], [0], [1], [0, 0, 1, 1], [], []>} : vector<1x32xf32>, vector<32x64xf32>, vector<1x64xf32> -> vector<1x64xf32>
    %288 = vector.extract_strided_slice %287 {offsets = [0, 0], sizes = [1, 32], strides = [1, 1]} : vector<1x64xf32> to vector<1x32xf32>
    %289 = vector.extract_strided_slice %286 {offsets = [0, 0], sizes = [1, 32], strides = [1, 1]} : vector<1x128xf32> to vector<1x32xf32>
    %290 = arith.addf %288, %289 : vector<1x32xf32>
    %291 = arith.addf %290, %7 : vector<1x32xf32>
    %cst_106 = arith.constant dense<0xFF800000> : vector<1xf32>
    %292 = vector.multi_reduction <maximumf>, %291, %cst_106 [1] : vector<1x32xf32> to vector<1xf32>
    %293 = vector.shape_cast %292 : vector<1xf32> to vector<1x1xf32>
    %294 = vector.broadcast %293 : vector<1x1xf32> to vector<1x32xf32>
    %295 = arith.subf %291, %294 : vector<1x32xf32>
    %296 = math.exp %295 : vector<1x32xf32>
    %cst_107 = arith.constant dense<0.000000e+00> : vector<1xf32>
    %297 = vector.multi_reduction <add>, %296, %cst_107 [1] : vector<1x32xf32> to vector<1xf32>
    %298 = vector.shape_cast %297 : vector<1xf32> to vector<1x1xf32>
    %299 = vector.broadcast %298 : vector<1x1xf32> to vector<1x32xf32>
    %300 = arith.divf %296, %299 : vector<1x32xf32>
    %cst_108 = arith.constant dense<0.000000e+00> : vector<1x32xf32>
    %301 = tpu.matmul %300, %11, %cst_108 {dimension_numbers = #tpu.dot_dimension_numbers<[1], [0], [0], [1], [0, 0, 1, 1], [], []>} : vector<1x32xf32>, vector<32x32xf32>, vector<1x32xf32> -> vector<1x32xf32>
    %302 = vector.extract_strided_slice %287 {offsets = [0, 32], sizes = [1, 32], strides = [1, 1]} : vector<1x64xf32> to vector<1x32xf32>
    %cst_109 = arith.constant dense<0.000000e+00> : vector<1x32xf32>
    %303 = tpu.matmul %301, %2, %cst_109 {dimension_numbers = #tpu.dot_dimension_numbers<[1], [0], [0], [1], [0, 0, 1, 1], [], []>} : vector<1x32xf32>, vector<32x32xf32>, vector<1x32xf32> -> vector<1x32xf32>
    %304 = arith.addf %302, %303 : vector<1x32xf32>
    %305 = arith.addf %304, %8 : vector<1x32xf32>
    %cst_110 = arith.constant 0.000000e+00 : f32
    %306 = vector.broadcast %cst_110 : f32 to vector<1x32xf32>
    %307 = arith.maximumf %305, %306 : vector<1x32xf32>
    %cst_111 = arith.constant dense<0.000000e+00> : vector<1x96xf32>
    %308 = tpu.matmul %307, %3, %cst_111 {dimension_numbers = #tpu.dot_dimension_numbers<[1], [0], [0], [1], [0, 0, 1, 1], [], []>} : vector<1x32xf32>, vector<32x96xf32>, vector<1x96xf32> -> vector<1x96xf32>
    %309 = arith.addf %308, %5 : vector<1x96xf32>
    %310 = vector.extract_strided_slice %286 {offsets = [0, 32], sizes = [1, 32], strides = [1, 1]} : vector<1x128xf32> to vector<1x32xf32>
    %311 = vector.extract_strided_slice %286 {offsets = [0, 64], sizes = [1, 32], strides = [1, 1]} : vector<1x128xf32> to vector<1x32xf32>
    %312 = vector.extract_strided_slice %286 {offsets = [0, 96], sizes = [1, 32], strides = [1, 1]} : vector<1x128xf32> to vector<1x32xf32>
    %313 = vector.extract_strided_slice %309 {offsets = [0, 0], sizes = [1, 32], strides = [1, 1]} : vector<1x96xf32> to vector<1x32xf32>
    %314 = arith.addf %313, %310 : vector<1x32xf32>
    %315 = arith.negf %314 : vector<1x32xf32>
    %316 = math.exp %315 : vector<1x32xf32>
    %cst_112 = arith.constant 1.000000e+00 : f32
    %317 = vector.broadcast %cst_112 : f32 to vector<1x32xf32>
    %318 = arith.addf %317, %316 : vector<1x32xf32>
    %319 = arith.divf %317, %318 : vector<1x32xf32>
    %320 = vector.extract_strided_slice %309 {offsets = [0, 32], sizes = [1, 32], strides = [1, 1]} : vector<1x96xf32> to vector<1x32xf32>
    %321 = arith.addf %320, %311 : vector<1x32xf32>
    %322 = arith.negf %321 : vector<1x32xf32>
    %323 = math.exp %322 : vector<1x32xf32>
    %cst_113 = arith.constant 1.000000e+00 : f32
    %324 = vector.broadcast %cst_113 : f32 to vector<1x32xf32>
    %325 = arith.addf %324, %323 : vector<1x32xf32>
    %326 = arith.divf %324, %325 : vector<1x32xf32>
    %327 = vector.extract_strided_slice %309 {offsets = [0, 64], sizes = [1, 32], strides = [1, 1]} : vector<1x96xf32> to vector<1x32xf32>
    %328 = arith.addf %312, %9 : vector<1x32xf32>
    %329 = arith.mulf %319, %328 : vector<1x32xf32>
    %330 = arith.addf %327, %329 : vector<1x32xf32>
    %331 = math.tanh %330 : vector<1x32xf32>
    %cst_114 = arith.constant 1.000000e+00 : f32
    %332 = vector.broadcast %cst_114 : f32 to vector<1x32xf32>
    %333 = arith.subf %332, %326 : vector<1x32xf32>
    %334 = arith.mulf %333, %331 : vector<1x32xf32>
    %335 = arith.mulf %326, %268 : vector<1x32xf32>
    %336 = arith.addf %334, %335 : vector<1x32xf32>
    %cst_115 = arith.constant dense<0.000000e+00> : vector<1x128xf32>
    %337 = tpu.matmul %336, %4, %cst_115 {dimension_numbers = #tpu.dot_dimension_numbers<[1], [0], [0], [1], [0, 0, 1, 1], [], []>} : vector<1x32xf32>, vector<32x128xf32>, vector<1x128xf32> -> vector<1x128xf32>
    %338 = arith.addf %337, %10 : vector<1x128xf32>
    %cst_116 = arith.constant dense<0xFF800000> : vector<1xf32>
    %339 = vector.multi_reduction <maximumf>, %338, %cst_116 [1] : vector<1x128xf32> to vector<1xf32>
    %340 = vector.shape_cast %339 : vector<1xf32> to vector<1x1xf32>
    %341 = vector.broadcast %340 : vector<1x1xf32> to vector<1x128xf32>
    %342 = arith.subf %338, %341 : vector<1x128xf32>
    %343 = math.exp %342 : vector<1x128xf32>
    %cst_117 = arith.constant dense<0.000000e+00> : vector<1xf32>
    %344 = vector.multi_reduction <add>, %343, %cst_117 [1] : vector<1x128xf32> to vector<1xf32>
    %345 = vector.shape_cast %344 : vector<1xf32> to vector<1x1xf32>
    %346 = math.log %345 : vector<1x1xf32>
    %347 = arith.addf %346, %340 : vector<1x1xf32>
    %348 = vector.broadcast %347 : vector<1x1xf32> to vector<1x128xf32>
    %349 = arith.subf %338, %348 : vector<1x128xf32>
    %c4_118 = arith.constant 4 : index
    %c0_119 = arith.constant 0 : index
    %350 = vector.load %arg11[%c4_118, %c0_119] : memref<6x128xf32, #tpu.memory_space<vmem>>, vector<1x128xf32>
    tpu.vector_store %arg11[%c4_118, %c0_119], %349 {strides = array<i32>} : memref<6x128xf32, #tpu.memory_space<vmem>>, vector<1x128xf32>,
    %c4_120 = arith.constant 4 : index
    %c0_121 = arith.constant 0 : index
    %351 = vector.load %arg12[%c4_120, %c0_121] : memref<6x32xf32, #tpu.memory_space<vmem>>, vector<1x32xf32>
    tpu.vector_store %arg12[%c4_120, %c0_121], %336 {strides = array<i32>} : memref<6x32xf32, #tpu.memory_space<vmem>>, vector<1x32xf32>,
    %c4_122 = arith.constant 4 : index
    %c0_123 = arith.constant 0 : index
    %352 = vector.load %arg13[%c4_122, %c0_123] : memref<6x32xf32, #tpu.memory_space<vmem>>, vector<1x32xf32>
    tpu.vector_store %arg13[%c4_122, %c0_123], %300 {strides = array<i32>} : memref<6x32xf32, #tpu.memory_space<vmem>>, vector<1x32xf32>,
    %c5 = arith.constant 5 : index
    %c0_124 = arith.constant 0 : index
    %353 = vector.load %arg0[%c5, %c0_124] : memref<6x32xf32, #tpu.memory_space<vmem>>, vector<1x32xf32>
    %cst_125 = arith.constant dense<0.000000e+00> : vector<1x128xf32>
    %354 = tpu.matmul %336, %0, %cst_125 {dimension_numbers = #tpu.dot_dimension_numbers<[1], [0], [0], [1], [0, 0, 1, 1], [], []>} : vector<1x32xf32>, vector<32x128xf32>, vector<1x128xf32> -> vector<1x128xf32>
    %cst_126 = arith.constant dense<0.000000e+00> : vector<1x64xf32>
    %355 = tpu.matmul %353, %1, %cst_126 {dimension_numbers = #tpu.dot_dimension_numbers<[1], [0], [0], [1], [0, 0, 1, 1], [], []>} : vector<1x32xf32>, vector<32x64xf32>, vector<1x64xf32> -> vector<1x64xf32>
    %356 = vector.extract_strided_slice %355 {offsets = [0, 0], sizes = [1, 32], strides = [1, 1]} : vector<1x64xf32> to vector<1x32xf32>
    %357 = vector.extract_strided_slice %354 {offsets = [0, 0], sizes = [1, 32], strides = [1, 1]} : vector<1x128xf32> to vector<1x32xf32>
    %358 = arith.addf %356, %357 : vector<1x32xf32>
    %359 = arith.addf %358, %7 : vector<1x32xf32>
    %cst_127 = arith.constant dense<0xFF800000> : vector<1xf32>
    %360 = vector.multi_reduction <maximumf>, %359, %cst_127 [1] : vector<1x32xf32> to vector<1xf32>
    %361 = vector.shape_cast %360 : vector<1xf32> to vector<1x1xf32>
    %362 = vector.broadcast %361 : vector<1x1xf32> to vector<1x32xf32>
    %363 = arith.subf %359, %362 : vector<1x32xf32>
    %364 = math.exp %363 : vector<1x32xf32>
    %cst_128 = arith.constant dense<0.000000e+00> : vector<1xf32>
    %365 = vector.multi_reduction <add>, %364, %cst_128 [1] : vector<1x32xf32> to vector<1xf32>
    %366 = vector.shape_cast %365 : vector<1xf32> to vector<1x1xf32>
    %367 = vector.broadcast %366 : vector<1x1xf32> to vector<1x32xf32>
    %368 = arith.divf %364, %367 : vector<1x32xf32>
    %cst_129 = arith.constant dense<0.000000e+00> : vector<1x32xf32>
    %369 = tpu.matmul %368, %11, %cst_129 {dimension_numbers = #tpu.dot_dimension_numbers<[1], [0], [0], [1], [0, 0, 1, 1], [], []>} : vector<1x32xf32>, vector<32x32xf32>, vector<1x32xf32> -> vector<1x32xf32>
    %370 = vector.extract_strided_slice %355 {offsets = [0, 32], sizes = [1, 32], strides = [1, 1]} : vector<1x64xf32> to vector<1x32xf32>
    %cst_130 = arith.constant dense<0.000000e+00> : vector<1x32xf32>
    %371 = tpu.matmul %369, %2, %cst_130 {dimension_numbers = #tpu.dot_dimension_numbers<[1], [0], [0], [1], [0, 0, 1, 1], [], []>} : vector<1x32xf32>, vector<32x32xf32>, vector<1x32xf32> -> vector<1x32xf32>
    %372 = arith.addf %370, %371 : vector<1x32xf32>
    %373 = arith.addf %372, %8 : vector<1x32xf32>
    %cst_131 = arith.constant 0.000000e+00 : f32
    %374 = vector.broadcast %cst_131 : f32 to vector<1x32xf32>
    %375 = arith.maximumf %373, %374 : vector<1x32xf32>
    %cst_132 = arith.constant dense<0.000000e+00> : vector<1x96xf32>
    %376 = tpu.matmul %375, %3, %cst_132 {dimension_numbers = #tpu.dot_dimension_numbers<[1], [0], [0], [1], [0, 0, 1, 1], [], []>} : vector<1x32xf32>, vector<32x96xf32>, vector<1x96xf32> -> vector<1x96xf32>
    %377 = arith.addf %376, %5 : vector<1x96xf32>
    %378 = vector.extract_strided_slice %354 {offsets = [0, 32], sizes = [1, 32], strides = [1, 1]} : vector<1x128xf32> to vector<1x32xf32>
    %379 = vector.extract_strided_slice %354 {offsets = [0, 64], sizes = [1, 32], strides = [1, 1]} : vector<1x128xf32> to vector<1x32xf32>
    %380 = vector.extract_strided_slice %354 {offsets = [0, 96], sizes = [1, 32], strides = [1, 1]} : vector<1x128xf32> to vector<1x32xf32>
    %381 = vector.extract_strided_slice %377 {offsets = [0, 0], sizes = [1, 32], strides = [1, 1]} : vector<1x96xf32> to vector<1x32xf32>
    %382 = arith.addf %381, %378 : vector<1x32xf32>
    %383 = arith.negf %382 : vector<1x32xf32>
    %384 = math.exp %383 : vector<1x32xf32>
    %cst_133 = arith.constant 1.000000e+00 : f32
    %385 = vector.broadcast %cst_133 : f32 to vector<1x32xf32>
    %386 = arith.addf %385, %384 : vector<1x32xf32>
    %387 = arith.divf %385, %386 : vector<1x32xf32>
    %388 = vector.extract_strided_slice %377 {offsets = [0, 32], sizes = [1, 32], strides = [1, 1]} : vector<1x96xf32> to vector<1x32xf32>
    %389 = arith.addf %388, %379 : vector<1x32xf32>
    %390 = arith.negf %389 : vector<1x32xf32>
    %391 = math.exp %390 : vector<1x32xf32>
    %cst_134 = arith.constant 1.000000e+00 : f32
    %392 = vector.broadcast %cst_134 : f32 to vector<1x32xf32>
    %393 = arith.addf %392, %391 : vector<1x32xf32>
    %394 = arith.divf %392, %393 : vector<1x32xf32>
    %395 = vector.extract_strided_slice %377 {offsets = [0, 64], sizes = [1, 32], strides = [1, 1]} : vector<1x96xf32> to vector<1x32xf32>
    %396 = arith.addf %380, %9 : vector<1x32xf32>
    %397 = arith.mulf %387, %396 : vector<1x32xf32>
    %398 = arith.addf %395, %397 : vector<1x32xf32>
    %399 = math.tanh %398 : vector<1x32xf32>
    %cst_135 = arith.constant 1.000000e+00 : f32
    %400 = vector.broadcast %cst_135 : f32 to vector<1x32xf32>
    %401 = arith.subf %400, %394 : vector<1x32xf32>
    %402 = arith.mulf %401, %399 : vector<1x32xf32>
    %403 = arith.mulf %394, %336 : vector<1x32xf32>
    %404 = arith.addf %402, %403 : vector<1x32xf32>
    %cst_136 = arith.constant dense<0.000000e+00> : vector<1x128xf32>
    %405 = tpu.matmul %404, %4, %cst_136 {dimension_numbers = #tpu.dot_dimension_numbers<[1], [0], [0], [1], [0, 0, 1, 1], [], []>} : vector<1x32xf32>, vector<32x128xf32>, vector<1x128xf32> -> vector<1x128xf32>
    %406 = arith.addf %405, %10 : vector<1x128xf32>
    %cst_137 = arith.constant dense<0xFF800000> : vector<1xf32>
    %407 = vector.multi_reduction <maximumf>, %406, %cst_137 [1] : vector<1x128xf32> to vector<1xf32>
    %408 = vector.shape_cast %407 : vector<1xf32> to vector<1x1xf32>
    %409 = vector.broadcast %408 : vector<1x1xf32> to vector<1x128xf32>
    %410 = arith.subf %406, %409 : vector<1x128xf32>
    %411 = math.exp %410 : vector<1x128xf32>
    %cst_138 = arith.constant dense<0.000000e+00> : vector<1xf32>
    %412 = vector.multi_reduction <add>, %411, %cst_138 [1] : vector<1x128xf32> to vector<1xf32>
    %413 = vector.shape_cast %412 : vector<1xf32> to vector<1x1xf32>
    %414 = math.log %413 : vector<1x1xf32>
    %415 = arith.addf %414, %408 : vector<1x1xf32>
    %416 = vector.broadcast %415 : vector<1x1xf32> to vector<1x128xf32>
    %417 = arith.subf %406, %416 : vector<1x128xf32>
    %c5_139 = arith.constant 5 : index
    %c0_140 = arith.constant 0 : index
    %418 = vector.load %arg11[%c5_139, %c0_140] : memref<6x128xf32, #tpu.memory_space<vmem>>, vector<1x128xf32>
    tpu.vector_store %arg11[%c5_139, %c0_140], %417 {strides = array<i32>} : memref<6x128xf32, #tpu.memory_space<vmem>>, vector<1x128xf32>,
    %c5_141 = arith.constant 5 : index
    %c0_142 = arith.constant 0 : index
    %419 = vector.load %arg12[%c5_141, %c0_142] : memref<6x32xf32, #tpu.memory_space<vmem>>, vector<1x32xf32>
    tpu.vector_store %arg12[%c5_141, %c0_142], %404 {strides = array<i32>} : memref<6x32xf32, #tpu.memory_space<vmem>>, vector<1x32xf32>,
    %c5_143 = arith.constant 5 : index
    %c0_144 = arith.constant 0 : index
    %420 = vector.load %arg13[%c5_143, %c0_144] : memref<6x32xf32, #tpu.memory_space<vmem>>, vector<1x32xf32>
    tpu.vector_store %arg13[%c5_143, %c0_144], %368 {strides = array<i32>} : memref<6x32xf32, #tpu.memory_space<vmem>>, vector<1x32xf32>,
    return
  }
}

</mosaic_0001>

<bundles_post_ra>
// kernel: tpu_custom_call.1
= control target key start
LH: loop header
LB: loop body
LE: loop exit
PB: predicated region body
PF: predicated region fallthrough
CT: control target
= control target key end

     0   :  { %19 = vsyncpa [#allocation3], 0  ;;  %s2650_s0 = inlined_call_operand.hbm [shape: f32[6,32], index: 0, kind: input, shape index: {}]   ;;  %s2651_s1 = inlined_call_operand.hbm [shape: f32[1,32], index: 1, kind: input, shape index: {}]   ;;  %s2652_s2 = inlined_call_operand.hbm [shape: f32[32,32], index: 2, kind: input, shape index: {}]   ;;  %s2653_s3 = inlined_call_operand.hbm [shape: f32[32,128], index: 3, kind: input, shape index: {}]   ;;  %s2654_s4 = inlined_call_operand.hbm [shape: f32[32,64], index: 4, kind: input, shape index: {}]   ;;  %s2655_s5 = inlined_call_operand.hbm [shape: f32[32,32], index: 5, kind: input, shape index: {}]   ;;  %s2656_s6 = inlined_call_operand.hbm [shape: f32[32,96], index: 6, kind: input, shape index: {}]   ;;  %s2657_s7 = inlined_call_operand.hbm [shape: f32[32,128], index: 7, kind: input, shape index: {}]   ;;  %s2658_s8 = inlined_call_operand.vmem [shape: f32[1,96], index: 8, kind: input, shape index: {}]   ;;  %s2659_s9 = inlined_call_operand.vmem [shape: f32[1,128], index: 9, kind: input, shape index: {}]   ;;  %s2660_s10 = inlined_call_operand.vmem [shape: f32[1,128], index: 10, kind: input, shape index: {}]   ;;  %s2661_s11 = inlined_call_operand.hbm [shape: f32[6,128], index: 11, kind: output, shape index: {0}]   ;;  %s2662_s12 = inlined_call_operand.hbm [shape: f32[6,32], index: 12, kind: output, shape index: {1}]   ;;  %s2663_s13 = inlined_call_operand.hbm [shape: f32[6,32], index: 13, kind: output, shape index: {2}]  }
   0x1   :  { %20 = vsyncpa [#allocation6], 0 }
   0x2   :  { %21 = vsyncpa [#allocation9], 0 }
   0x3   :  { %22 = vsyncpa [#allocation12], 0 }
   0x4   :  { %23 = vsyncpa [#allocation15], 0 }
   0x5   :  { %24 = vsyncpa [#allocation4], 0  ;;  %s42_s27 = sshll.u32 %s2651_s1, 4  ;;  %s43_s27 = int_to_ptr.hbm [resolvable:$true] %s42_s27 }
   0x6   :  { %25 = vsyncpa [#allocation18], 0  ;;  %s2091_s28 = smov [#allocation5]   ;;  %s65_s15 = sshll.u32 %s2653_s3, 4  ;;  %s66_s15 = int_to_ptr.hbm [resolvable:$true] %s65_s15 }
   0x7   :  { %s44_s29 = sshll.u32 %s2091_s28, 4  ;;  %s2092_s16 = smov [#allocation8]   ;;  %s45_s29 = int_to_ptr.vmem [resolvable:$true] %s44_s29 }
   0x8   :  { %47 = dma.hbm_to_vmem [thread:$0]  %s43_s27, 16, %s45_s29, [#allocation6]  }
   0x9   :  { %s67_s17 = sshll.u32 %s2092_s16, 4  ;;  %s91_s20 = sshll.u32 %s2655_s5, 4  ;;  %s68_s17 = int_to_ptr.vmem [resolvable:$true] %s67_s17  ;;  %s92_s20 = int_to_ptr.hbm [resolvable:$true] %s91_s20 }
   0xa   :  { %s2093_s1 = smov 128   ;;  %s2094_s21 = smov 8  }
   0xb   :  { %73 = dma.hbm_to_vmem [thread:$0]  %s66_s15, 512, %s68_s17, [#allocation9], %s2093_s1, %s2093_s1, %s2094_s21  }
   0xc   :  { %s31_s24 = sshll.u32 %s2650_s0, 4  ;;  %s2095_s3 = smov [#allocation11]   ;;  %s32_s24 = int_to_ptr.hbm [resolvable:$true] %s31_s24 }
   0xd   :  { %s93_s25 = sshll.u32 %s2095_s3, 4  ;;  %s2096_s5 = smov [#allocation2]   ;;  %s94_s25 = int_to_ptr.vmem [resolvable:$true] %s93_s25 }
   0xe   :  { %99 = dma.hbm_to_vmem [thread:$0]  %s92_s20, 512, %s94_s25, [#allocation12], %s2093_s1, %s2093_s1, %s2094_s21  }
   0xf   :  { %s33_s26 = sshll.u32 %s2096_s5, 4  ;;  %s52_s29 = sshll.u32 %s2652_s2, 4  ;;  %s34_s26 = int_to_ptr.vmem [resolvable:$true] %s33_s26  ;;  %s53_s29 = int_to_ptr.hbm [resolvable:$true] %s52_s29 }
  0x10   :  { %36 = dma.hbm_to_vmem [thread:$0]  %s32_s24, 128, %s34_s26, [#allocation3]  }
  0x11   :  { %s78_s0 = sshll.u32 %s2654_s4, 4  ;;  %s2097_s15 = smov [#allocation7]   ;;  %s79_s0 = int_to_ptr.hbm [resolvable:$true] %s78_s0 }
  0x12   :  { %s54_s16 = sshll.u32 %s2097_s15, 4  ;;  %s2098_s17 = smov [#allocation10]   ;;  %s55_s16 = int_to_ptr.vmem [resolvable:$true] %s54_s16 }
  0x13   :  { %60 = dma.hbm_to_vmem [thread:$0]  %s53_s29, 512, %s55_s16, [#allocation6], %s2093_s1, %s2093_s1, %s2094_s21  }
  0x14   :  { %s80_s18 = sshll.u32 %s2098_s17, 4  ;;  %s104_s2 = sshll.u32 %s2656_s6, 4  ;;  %s81_s18 = int_to_ptr.vmem [resolvable:$true] %s80_s18  ;;  %s105_s2 = int_to_ptr.hbm [resolvable:$true] %s104_s2 }
  0x15   :  { %86 = dma.hbm_to_vmem [thread:$0]  %s79_s0, 512, %s81_s18, [#allocation9], %s2093_s1, %s2093_s1, %s2094_s21  }
  0x16   :  { %s117_s23 = sshll.u32 %s2657_s7, 4  ;;  %s2099_s24 = smov [#allocation13]   ;;  %s118_s23 = int_to_ptr.hbm [resolvable:$true] %s117_s23 }
  0x17   :  { %s106_s3 = sshll.u32 %s2099_s24, 4  ;;  %s2100_s25 = smov [#allocation14]   ;;  %s107_s3 = int_to_ptr.vmem [resolvable:$true] %s106_s3 }
  0x18   :  { %112 = dma.hbm_to_vmem [thread:$0]  %s105_s2, 512, %s107_s3, [#allocation12], %s2093_s1, %s2093_s1, %s2094_s21  }
  0x19   :  { %s119_s6 = sshll.u32 %s2100_s25, 4  ;;  %s120_s6 = int_to_ptr.vmem [resolvable:$true] %s119_s6 }
  0x1a   :  { %125 = dma.hbm_to_vmem [thread:$0]  %s118_s23, 512, %s120_s6, [#allocation15], %s2093_s1, %s2093_s1, %s2094_s21  }
  0x1b   :  { %2077 = dma.done.wait [#allocation3], 128  }
  0x1c   :  { %2078 = vsyncadd [#allocation3], 4294967168 }
  0x1d   :  { %2079 = dma.done.wait [#allocation6], 528  }
  0x1e   :  { %2080 = vsyncadd [#allocation6], 4294966768 }
  0x1f   :  { %2081 = dma.done.wait [#allocation9], 1024  }
  0x20   :  { %2082 = vsyncadd [#allocation9], 4294966272 }
  0x21   :  { %2083 = dma.done.wait [#allocation12], 1024  }
  0x22   :  { %2084 = vsyncadd [#allocation12], 4294966272 }
  0x23   :  { %2085 = dma.done.wait [#allocation15], 512  }
  0x24   :  { %2086 = vsyncadd [#allocation15], 4294966784  ;;  %v2219_v0 = vld [vmem:[#allocation8 + $0x18] sm:$0xff]  ;;  %v2223_v2 = vld [vmem:[#allocation8 + $0x10] sm:$0xff]  ;;  %vm193_vm0 = vcmask 261120   ;;  %s2101_s21 = smov 32  }
  0x25   :  { %v2221_v1 = vld [vmem:[#allocation10 + $0x18] sm:$0xff]  ;;  %209 = vmatpush.msra.mxu0 %v2219_v0  ;;  %v2227_v3 = vld [vmem:[#allocation10 + $0x10] sm:$0xff]  ;;  %v2229_v4 = vld [vmem:[#allocation8 + $0x8] sm:$0xff]  ;;  %s2102_s27 = smov 96   ;;  %vm242_vm1 = vcmask 253952   ;;  %s2103_s30 = smov 64  }
  0x26   :  { %232 = vmatpush.msra.mxu1 %v2221_v1  ;;  %v2231_v5 = vld [vmem:[#allocation10 + $0x8] sm:$0xff]  ;;  %v2235_v6 = vld [vmem:[#allocation8] sm:$0xff]  ;;  %v1722_v8 = vld [vmem:[%s2659_s9] ss:$0 sm:$0xff]  ;;  %s1629_s20 = sshll.u32 %s2662_s12, 4  ;;  %s2105_s2 = smov [#allocation19]   ;;  %s1630_s20 = int_to_ptr.hbm [resolvable:$true] %s1629_s20 }
  0x27   :  { %210 = vmatpush.msra.mxu0 %v2223_v2  ;;  %v2237_v7 = vld [vmem:[#allocation10] sm:$0xff]  ;;  %v191_v9 = vld [vmem:[#allocation5] sm:$0x1]  ;;  %v192_v10 = vld [vmem:[#allocation2] sm:$0x1]  ;;  %371 = vrot.lane.b32.xlu2 %v1722_v8, %s2101_s21  ;;  %s1638_s4 = sshll.u32 %s2105_s2, 4  ;;  %s1639_s4 = int_to_ptr.vmem [resolvable:$true] %s1638_s4 }
  0x28   :  { %233 = vmatpush.msra.mxu1 %v2227_v3  ;;  %v2252_v11 = vld [vmem:[%s2659_s9] sm:$0x1]  ;;  %v2265_v24 = vld [vmem:[#allocation7 + $0x18] sm:$0xff]  ;;  %v2270_v26 = vld [vmem:[#allocation7 + $0x8] sm:$0xff]  ;;  %s1640_s24 = sshll.u32 %s2663_s13, 4  ;;  %s2106_s12 = smov [#allocation16]   ;;  %s1641_s24 = int_to_ptr.hbm [resolvable:$true] %s1640_s24 }
  0x29   :  { %211 = vmatpush.msra.mxu0 %v2229_v4  ;;  %v2267_v25 = vld [vmem:[#allocation7 + $0x10] sm:$0xff]  ;;  %282 = vmatpush.msra.mxu2 %v2265_v24  ;;  %v2273_v27 = vld [vmem:[#allocation7] sm:$0xff]  ;;  %v2277_v28 = vld [vmem:[#allocation11 + $0x18] sm:$0xff]  ;;  %s1616_s3 = sshll.u32 %s2106_s12, 4  ;;  %s1618_s6 = sshll.u32 %s2661_s11, 4  ;;  %s1617_s3 = int_to_ptr.vmem [resolvable:$true] %s1616_s3  ;;  %s1619_s6 = int_to_ptr.hbm [resolvable:$true] %s1618_s6 }
  0x2a   :  { %234 = vmatpush.msra.mxu1 %v2231_v5  ;;  %v2279_v29 = vld [vmem:[#allocation11 + $0x10] sm:$0xff]  ;;  %305 = vmatpush.msra.mxu3 %v2277_v28  ;;  %v2283_v30 = vld [vmem:[#allocation11 + $0x8] sm:$0xff]  ;;  %v2292_v43 = vld [vmem:[#allocation11] sm:$0xff] }
  0x2b   :  { %212 = vmatpush.msra.mxu0 %v2235_v6  ;;  %283 = vmatpush.msra.mxu2 %v2267_v25  ;;  %v2301_v46 = vld [vmem:[#allocation13 + $0x18] sm:$0xff]  ;;  %v2303_v47 = vld [vmem:[#allocation13 + $0x10] sm:$0xff]  ;;  %v2307_v48 = vld [vmem:[#allocation13 + $0x8] sm:$0xff] }
  0x2c   :  { %235 = vmatpush.msra.mxu1 %v2237_v7  ;;  %1663 = vmatmul.msk.f32.vlgmr.msra.gmra.mxu0 %vm193_vm0, %v191_v9  ;;  %v2311_v49 = vld [vmem:[#allocation13] sm:$0xff]  ;;  %v2332_v55 = vld [vmem:[%s2658_s8] sm:$0x1] }
  0x2d   :  { %1664 = vmatmul.msk.f32.vlgmr.msra.gmra.mxu1 %vm193_vm0, %v192_v10  ;;  %284 = vmatpush.msra.mxu2 %v2270_v26 }
  0x2e   :  { %306 = vmatpush.msra.mxu3 %v2279_v29  ;;  %337 = vmatpush.msrb.mxu0 %v2301_v46 }
  0x2f   :  { %285 = vmatpush.msra.mxu2 %v2273_v27 }
  0x30   :  { %307 = vmatpush.msra.mxu3 %v2283_v30  ;;  %338 = vmatpush.msrb.mxu0 %v2303_v47 }
  0x31   :  { %454 = vmatpush.msrb.mxu2 %v2219_v0 }
  0x32   :  { %308 = vmatpush.msra.mxu3 %v2292_v43  ;;  %339 = vmatpush.msrb.mxu0 %v2307_v48 }
  0x33   :  { %455 = vmatpush.msrb.mxu2 %v2223_v2 }
  0x34   :  { %477 = vmatpush.msrb.mxu3 %v2221_v1  ;;  %340 = vmatpush.msrb.mxu0 %v2311_v49 }
  0x35   :  { %456 = vmatpush.msrb.mxu2 %v2229_v4 }
  0x36   :  { %478 = vmatpush.msrb.mxu3 %v2227_v3  ;;  %526 = vmatpush.msra.mxu0 %v2265_v24 }
  0x37   :  { %457 = vmatpush.msrb.mxu2 %v2235_v6 }
  0x38   :  { %479 = vmatpush.msrb.mxu3 %v2231_v5  ;;  %527 = vmatpush.msra.mxu0 %v2267_v25 }
  0x3a   :  { %480 = vmatpush.msrb.mxu3 %v2237_v7  ;;  %528 = vmatpush.msra.mxu0 %v2270_v26 }
  0x3c   :  { %529 = vmatpush.msra.mxu0 %v2273_v27 }
  0x81   :  { %v2261_v22 = vpop.permute.xlu2 %371 }
  0xa9   :  { %v214_v12 = vpop.f32.mrf.mxu0 }
  0xaa   :  { %v2254_v13 = vpop.f32.mrf.mxu1  ;;  %346 = vrot.lane.b32.xlu2 %v214_v12, %s2102_s27  ;;  %v374_v23 = vadd.f32 %v2261_v22, %v214_v12 }
  0xab   :  { %v240_v14 = vadd.f32 %v2254_v13, %v214_v12 }
  0xad   :  { %v241_v15 = vadd.f32 %v240_v14, %v2252_v11 }
  0xaf   :  { %v243_v16 = vsel %vm242_vm1, %v241_v15, -inf }
  0xb0   :  { %244 = vmax.xlane.f32.xlu0 %v243_v16 }
 0x104   :  { %v347_v58 = vpop.permute.xlu2 %346 }
 0x123   :  { %v245_v17 = vpop.xlane.xlu0 %244 }
 0x124   :  { %v246_v18 = vsub.f32 %v241_v15, %v245_v17 }
 0x126   :  { %v247_v19 = vmul.f32 1.442695, %v246_v18 }
 0x128   :  { %1723 = vpow2.f32 %v247_v19 }
 0x12e   :  { %v1724_v20 = vpop.eup %1723 }
 0x12f   :  { %v249_v21 = vsel %vm242_vm1, %v1724_v20, 0.0 }
 0x130   :  { %250 = vadd.xlane.f32.xlu0 %v249_v21 }
 0x144   :  { %376 = vrot.lane.b32.xlu0 %v374_v23, %s2101_s21 }
 0x1a3   :  { %v251_v31 = vpop.xlane.xlu0 %250 }
 0x1a4   :  { %1725 = vrcp.f32 %v251_v31  ;;  %v263_v35 = vand.u32 2147483648, %v251_v31  ;;  %v261_v37 = vand.u32 2147483647, %v251_v31  ;;  %vm257_vm3 = vweird.f32 %v251_v31 }
 0x1a6   :  { %v264_v39 = vor.u32 1.1754944e-38, %v263_v35  ;;  %vm262_vm5 = vcmp.eq.f32.partialorder %v261_v37, 8.507059e+37  ;;  %v2348_v35 = vld [vmem:[#allocation14] sm:$0xff] }
 0x1aa   :  { %v1726_v32 = vpop.eup %1725 }
 0x1ab   :  { %v253_v33 = vmul.f32 %v1726_v32, %v251_v31  ;;  %vm258_vm2 = vweird.f32 %v1726_v32 }
 0x1ac   :  { %vm259_vm4 = vmor %vm257_vm3, %vm258_vm2 }
 0x1ad   :  { %v254_v34 = vsub.f32 1.0, %v253_v33  ;;  %v2340_v33 = vld [vmem:[#allocation14 + $0x10] sm:$0xff] }
 0x1af   :  { %v255_v36 = vmul.f32 %v1726_v32, %v254_v34  ;;  %v2344_v34 = vld [vmem:[#allocation14 + $0x8] sm:$0xff] }
 0x1b1   :  { %v256_v38 = vadd.f32 %v1726_v32, %v255_v36 }
 0x1b3   :  { %v260_v40 = vsel %vm259_vm4, %v1726_v32, %v256_v38  ;;  %v2338_v32 = vld [vmem:[#allocation14 + $0x18] sm:$0xff] }
 0x1b4   :  { %v265_v41 = vsel %vm262_vm5, %v264_v39, %v260_v40  ;;  %415 = vmatpush.msrb.mxu1 %v2338_v32 }
 0x1b5   :  { %v266_v42 = vmul.f32 %v1724_v20, %v265_v41  ;;  %v1721_v20 = vld [vmem:[#allocation5] ss:$0 sm:$0xff] }
 0x1b6   :  { %v377_v17 = vpop.permute.xlu0 %376  ;;  %416 = vmatpush.msrb.mxu1 %v2340_v33 }
 0x1b7   :  { %1665 = vmatmul.msk.f32.vlgmr.msra.gmra.mxu2 %vm193_vm0, %v266_v42  ;;  %440 = vst.msk [vmem:[#allocation19] sm:$0x1] %vm242_vm1, %v266_v42  ;;  %v441_v42 = vld [vmem:[#allocation2 + $0x1] sm:$0x1] }
 0x1b8   :  { %581 = vmatpush.msra.mxu2 %v2301_v46  ;;  %417 = vmatpush.msrb.mxu1 %v2344_v34 }
 0x1ba   :  { %582 = vmatpush.msra.mxu2 %v2303_v47  ;;  %418 = vmatpush.msrb.mxu1 %v2348_v35 }
 0x1bc   :  { %583 = vmatpush.msra.mxu2 %v2307_v48  ;;  %549 = vmatpush.msra.mxu1 %v2277_v28 }
 0x1be   :  { %584 = vmatpush.msra.mxu2 %v2311_v49  ;;  %550 = vmatpush.msra.mxu1 %v2279_v29 }
 0x1c0   :  { %551 = vmatpush.msra.mxu1 %v2283_v30 }
 0x1c2   :  { %552 = vmatpush.msra.mxu1 %v2292_v43 }
 0x23a   :  { %v287_v44 = vpop.f32.mrf.mxu2 }
 0x23b   :  { %1666 = vmatmul.msk.f32.vlgmr.msra.gmra.mxu3 %vm193_vm0, %v287_v44 }
 0x23c   :  { %650 = vmatpush.msra.mxu3 %v2338_v32 }
 0x23e   :  { %651 = vmatpush.msra.mxu3 %v2340_v33 }
 0x240   :  { %652 = vmatpush.msra.mxu3 %v2344_v34 }
 0x242   :  { %653 = vmatpush.msra.mxu3 %v2348_v35 }
 0x243   :  { %1671 = vmatmul.msk.f32.vlgmr.msrb.gmra.mxu3 %vm193_vm0, %v441_v42 }
 0x244   :  { %783 = vmatpush.msrb.mxu3 %v2277_v28 }
 0x246   :  { %784 = vmatpush.msrb.mxu3 %v2279_v29 }
 0x248   :  { %785 = vmatpush.msrb.mxu3 %v2283_v30 }
 0x24a   :  { %786 = vmatpush.msrb.mxu3 %v2292_v43 }
 0x2be   :  { %v310_v45 = vpop.f32.mrf.mxu3 }
 0x2bf   :  { %314 = vrot.lane.b32.xlu1 %v310_v45, %s2101_s21 }
 0x2c6   :  { %v482_v45 = vpop.f32.mrf.mxu3 }
 0x331   :  { %v315_v50 = vpop.permute.xlu1 %314 }
 0x332   :  { %v317_v51 = vadd.f32 %v315_v50, %v2254_v13 }
 0x334   :  { %v318_v52 = vadd.f32 %v317_v51, %v2252_v11 }
 0x336   :  { %v319_v53 = vmax.f32 %v318_v52, 0.0 }
 0x338   :  { %321 = vrot.lane.b32.xlu1 %v319_v53, %s2102_s27 }
 0x3aa   :  { %v322_v54 = vpop.permute.xlu1 %321 }
 0x3ab   :  { %1667 = vmatmul.msk.f32.vlgmr.msrb.gmra.mxu0 %vm193_vm0, %v322_v54 }
 0x3ac   :  { %688 = vmatpush.msrb.mxu0 %v2219_v0 }
 0x3ae   :  { %689 = vmatpush.msrb.mxu0 %v2223_v2 }
 0x3b0   :  { %690 = vmatpush.msrb.mxu0 %v2229_v4 }
 0x3b2   :  { %691 = vmatpush.msrb.mxu0 %v2235_v6 }
 0x428   :  { %v342_v56 = vpop.f32.mrf.mxu0 }
 0x429   :  { %v343_v57 = vadd.f32 %v342_v56, %v2332_v55 }
 0x42b   :  { %v349_v59 = vadd.f32 %v347_v58, %v343_v57 }
 0x42d   :  { %v1668_v60 = vmul.f32 -1.442695, %v349_v59 }
 0x42f   :  { %1727 = vpow2.f32 %v1668_v60 }
 0x435   :  { %v1728_v61 = vpop.eup %1727 }
 0x436   :  { %v353_v62 = vadd.f32 1.0, %v1728_v61 }
 0x438   :  { %1729 = vrcp.f32 %v353_v62  ;;  %v365_v10 = vand.u32 2147483648, %v353_v62  ;;  %v363_v13 = vand.u32 2147483647, %v353_v62  ;;  %vm359_vm7 = vweird.f32 %v353_v62 }
 0x43a   :  { %v366_v15 = vor.u32 1.1754944e-38, %v365_v10  ;;  %vm364_vm9 = vcmp.eq.f32.partialorder %v363_v13, 8.507059e+37 }
 0x43e   :  { %v1730_v63 = vpop.eup %1729 }
 0x43f   :  { %v355_v8 = vmul.f32 %v1730_v63, %v353_v62  ;;  %vm360_vm6 = vweird.f32 %v1730_v63 }
 0x440   :  { %vm361_vm8 = vmor %vm359_vm7, %vm360_vm6 }
 0x441   :  { %v356_v9 = vsub.f32 1.0, %v355_v8 }
 0x443   :  { %v357_v12 = vmul.f32 %v1730_v63, %v356_v9 }
 0x445   :  { %v358_v14 = vadd.f32 %v1730_v63, %v357_v12 }
 0x447   :  { %v362_v16 = vsel %vm361_vm8, %v1730_v63, %v358_v14 }
 0x448   :  { %v367_v18 = vsel %vm364_vm9, %v366_v15, %v362_v16 }
 0x449   :  { %v379_v19 = vmul.f32 %v377_v17, %v367_v18  ;;  %v386_v37 = vsub.f32 1.0, %v367_v18 }
 0x44b   :  { %381 = vrot.lane.b32.xlu1 %v379_v19, %s2103_s30 }
 0x453   :  { %393 = vrot.lane.b32.xlu1 %v1721_v20, %s2101_s21 }
 0x4bd   :  { %v382_v21 = vpop.permute.xlu1 %381 }
 0x4be   :  { %v384_v23 = vadd.f32 %v382_v21, %v343_v57 }
 0x4c0   :  { %1731 = vtanh.f32 %v384_v23 }
 0x4c5   :  { %v394_v36 = vpop.permute.xlu1 %393 }
 0x4c6   :  { %v1732_v31 = vpop.eup %1731  ;;  %v396_v39 = vmul.f32 %v394_v36, %v367_v18 }
 0x4c7   :  { %388 = vrot.lane.b32.xlu2 %v1732_v31, %s2102_s27 }
 0x521   :  { %v389_v38 = vpop.permute.xlu2 %388 }
 0x522   :  { %v391_v40 = vmul.f32 %v389_v38, %v386_v37 }
 0x524   :  { %v2358_v41 = vadd.f32 %v396_v39, %v391_v40 }
 0x526   :  { %399 = vrot.lane.b32.xlu2 %v2358_v41, %s2102_s27 }
 0x580   :  { %v400_v44 = vpop.permute.xlu2 %399 }
 0x581   :  { %439 = vst.msk [vmem:[#allocation17] sm:$0x1] %vm242_vm1, %v400_v44  ;;  %1669 = vmatmul.msk.f32.vlgmr.msrb.gmra.mxu1 %vm193_vm0, %v400_v44  ;;  %1670 = vmatmul.msk.f32.vlgmr.msrb.gmra.mxu2 %vm193_vm0, %v400_v44 }
 0x582   :  { %711 = vmatpush.msrb.mxu1 %v2221_v1  ;;  %760 = vmatpush.msrb.mxu2 %v2265_v24 }
 0x584   :  { %712 = vmatpush.msrb.mxu1 %v2227_v3  ;;  %761 = vmatpush.msrb.mxu2 %v2267_v25 }
 0x586   :  { %713 = vmatpush.msrb.mxu1 %v2231_v5  ;;  %762 = vmatpush.msrb.mxu2 %v2270_v26 }
 0x588   :  { %714 = vmatpush.msrb.mxu1 %v2237_v7  ;;  %763 = vmatpush.msrb.mxu2 %v2273_v27 }
 0x5fe   :  { %v2392_v18 = vpop.f32.mrf.mxu1 }
 0x604   :  { %v459_v50 = vpop.f32.mrf.mxu2 }
 0x605   :  { %v485_v51 = vadd.f32 %v482_v45, %v459_v50  ;;  %v613_v36 = vadd.f32 %v459_v50, %v2261_v22 }
 0x607   :  { %v486_v52 = vadd.f32 %v485_v51, %v2252_v11 }
 0x609   :  { %v487_v53 = vsel %vm242_vm1, %v486_v52, -inf }
 0x60a   :  { %488 = vmax.xlane.f32.xlu1 %v487_v53 }
 0x67d   :  { %v489_v54 = vpop.xlane.xlu1 %488 }
 0x67e   :  { %v490_v56 = vsub.f32 %v486_v52, %v489_v54 }
 0x680   :  { %v491_v57 = vmul.f32 1.442695, %v490_v56 }
 0x682   :  { %1733 = vpow2.f32 %v491_v57 }
 0x688   :  { %v1734_v58 = vpop.eup %1733 }
 0x689   :  { %v493_v59 = vsel %vm242_vm1, %v1734_v58, 0.0 }
 0x68a   :  { %494 = vadd.xlane.f32.xlu2 %v493_v59 }
 0x6fd   :  { %v495_v60 = vpop.xlane.xlu2 %494 }
 0x6fe   :  { %1735 = vrcp.f32 %v495_v60  ;;  %v507_v8 = vand.u32 2147483648, %v495_v60  ;;  %v505_v10 = vand.u32 2147483647, %v495_v60  ;;  %vm501_vm11 = vweird.f32 %v495_v60 }
 0x700   :  { %v508_v13 = vor.u32 1.1754944e-38, %v507_v8  ;;  %vm506_vm13 = vcmp.eq.f32.partialorder %v505_v10, 8.507059e+37 }
 0x704   :  { %v1736_v61 = vpop.eup %1735 }
 0x705   :  { %v497_v62 = vmul.f32 %v1736_v61, %v495_v60  ;;  %vm502_vm10 = vweird.f32 %v1736_v61 }
 0x706   :  { %vm503_vm12 = vmor %vm501_vm11, %vm502_vm10 }
 0x707   :  { %v498_v63 = vsub.f32 1.0, %v497_v62 }
 0x709   :  { %v499_v9 = vmul.f32 %v1736_v61, %v498_v63 }
 0x70b   :  { %v500_v12 = vadd.f32 %v1736_v61, %v499_v9 }
 0x70d   :  { %v504_v14 = vsel %vm503_vm12, %v1736_v61, %v500_v12 }
 0x70e   :  { %v509_v15 = vsel %vm506_vm13, %v508_v13, %v504_v14 }
 0x70f   :  { %v510_v16 = vmul.f32 %v1734_v58, %v509_v15 }
 0x711   :  { %1672 = vmatmul.msk.f32.vlgmr.msra.gmra.mxu0 %vm193_vm0, %v510_v16  ;;  %674 = vst.msk [vmem:[#allocation19 + $0x1] sm:$0x1] %vm242_vm1, %v510_v16 }
 0x712   :  { %815 = vmatpush.msra.mxu0 %v2301_v46 }
 0x714   :  { %816 = vmatpush.msra.mxu0 %v2303_v47 }
 0x716   :  { %817 = vmatpush.msra.mxu0 %v2307_v48 }
 0x718   :  { %818 = vmatpush.msra.mxu0 %v2311_v49 }
 0x78e   :  { %v531_v17 = vpop.f32.mrf.mxu0 }
 0x78f   :  { %1673 = vmatmul.msk.f32.vlgmr.msra.gmra.mxu1 %vm193_vm0, %v531_v17  ;;  %v675_v17 = vld [vmem:[#allocation2 + $0x2] sm:$0x1] }
 0x790   :  { %884 = vmatpush.msra.mxu1 %v2338_v32 }
 0x792   :  { %885 = vmatpush.msra.mxu1 %v2340_v33 }
 0x794   :  { %886 = vmatpush.msra.mxu1 %v2344_v34 }
 0x796   :  { %887 = vmatpush.msra.mxu1 %v2348_v35 }
 0x797   :  { %1678 = vmatmul.msk.f32.vlgmr.msrb.gmra.mxu1 %vm193_vm0, %v675_v17 }
 0x798   :  { %1017 = vmatpush.msrb.mxu1 %v2277_v28 }
 0x79a   :  { %1018 = vmatpush.msrb.mxu1 %v2279_v29 }
 0x79c   :  { %1019 = vmatpush.msrb.mxu1 %v2283_v30 }
 0x79e   :  { %1020 = vmatpush.msrb.mxu1 %v2292_v43 }
 0x80c   :  { %v554_v19 = vpop.f32.mrf.mxu1 }
 0x80d   :  { %558 = vrot.lane.b32.xlu0 %v554_v19, %s2101_s21 }
 0x87f   :  { %v559_v20 = vpop.permute.xlu0 %558 }
 0x880   :  { %v561_v21 = vadd.f32 %v559_v20, %v482_v45 }
 0x882   :  { %v562_v23 = vadd.f32 %v561_v21, %v2252_v11 }
 0x884   :  { %v563_v31 = vmax.f32 %v562_v23, 0.0 }
 0x886   :  { %565 = vrot.lane.b32.xlu0 %v563_v31, %s2102_s27 }
 0x88e   :  { %590 = vrot.lane.b32.xlu0 %v459_v50, %s2102_s27 }
 0x896   :  { %615 = vrot.lane.b32.xlu0 %v613_v36, %s2101_s21 }
 0x8f8   :  { %v566_v37 = vpop.permute.xlu0 %565 }
 0x8f9   :  { %1674 = vmatmul.msk.f32.vlgmr.msra.gmra.mxu2 %vm193_vm0, %v566_v37 }
 0x8fa   :  { %922 = vmatpush.msra.mxu2 %v2219_v0 }
 0x8fc   :  { %923 = vmatpush.msra.mxu2 %v2223_v2 }
 0x8fe   :  { %924 = vmatpush.msra.mxu2 %v2229_v4 }
 0x900   :  { %925 = vmatpush.msra.mxu2 %v2235_v6  ;;  %v591_v40 = vpop.permute.xlu0 %590 }
 0x908   :  { %v616_v61 = vpop.permute.xlu0 %615 }
 0x97c   :  { %v586_v38 = vpop.f32.mrf.mxu2 }
 0x97d   :  { %v587_v39 = vadd.f32 %v586_v38, %v2332_v55 }
 0x97f   :  { %v593_v42 = vadd.f32 %v591_v40, %v587_v39 }
 0x981   :  { %v1675_v44 = vmul.f32 -1.442695, %v593_v42 }
 0x983   :  { %1737 = vpow2.f32 %v1675_v44 }
 0x989   :  { %v1738_v45 = vpop.eup %1737 }
 0x98a   :  { %v597_v50 = vadd.f32 1.0, %v1738_v45 }
 0x98c   :  { %1739 = vrcp.f32 %v597_v50  ;;  %v609_v54 = vand.u32 2147483648, %v597_v50  ;;  %v607_v57 = vand.u32 2147483647, %v597_v50  ;;  %vm603_vm15 = vweird.f32 %v597_v50 }
 0x98e   :  { %v610_v59 = vor.u32 1.1754944e-38, %v609_v54  ;;  %vm608_vm3 = vcmp.eq.f32.partialorder %v607_v57, 8.507059e+37 }
 0x992   :  { %v1740_v51 = vpop.eup %1739 }
 0x993   :  { %v599_v52 = vmul.f32 %v1740_v51, %v597_v50  ;;  %vm604_vm14 = vweird.f32 %v1740_v51 }
 0x994   :  { %vm605_vm2 = vmor %vm603_vm15, %vm604_vm14 }
 0x995   :  { %v600_v53 = vsub.f32 1.0, %v599_v52 }
 0x997   :  { %v601_v56 = vmul.f32 %v1740_v51, %v600_v53 }
 0x999   :  { %v602_v58 = vadd.f32 %v1740_v51, %v601_v56 }
 0x99b   :  { %v606_v60 = vsel %vm605_vm2, %v1740_v51, %v602_v58 }
 0x99c   :  { %v611_v62 = vsel %vm608_vm3, %v610_v59, %v606_v60 }
 0x99d   :  { %v618_v63 = vmul.f32 %v616_v61, %v611_v62  ;;  %v625_v12 = vsub.f32 1.0, %v611_v62  ;;  %v631_v14 = vmul.f32 %v611_v62, %v2358_v41  ;;  %v716_v41 = vpop.f32.mrf.mxu1 }
 0x99f   :  { %620 = vrot.lane.b32.xlu0 %v618_v63, %s2103_s30 }
 0xa11   :  { %v621_v8 = vpop.permute.xlu0 %620 }
 0xa12   :  { %v623_v9 = vadd.f32 %v621_v8, %v587_v39 }
 0xa14   :  { %1741 = vtanh.f32 %v623_v9 }
 0xa1a   :  { %v1742_v10 = vpop.eup %1741 }
 0xa1b   :  { %627 = vrot.lane.b32.xlu2 %v1742_v10, %s2102_s27 }
 0xa75   :  { %v628_v13 = vpop.permute.xlu2 %627 }
 0xa76   :  { %v630_v15 = vmul.f32 %v628_v13, %v625_v12 }
 0xa78   :  { %v2409_v16 = vadd.f32 %v631_v14, %v630_v15 }
 0xa7a   :  { %634 = vrot.lane.b32.xlu1 %v2409_v16, %s2102_s27 }
 0xaec   :  { %v635_v19 = vpop.permute.xlu1 %634 }
 0xaed   :  { %673 = vst.msk [vmem:[#allocation17 + $0x1] sm:$0x1] %vm242_vm1, %v635_v19  ;;  %1676 = vmatmul.msk.f32.vlgmr.msra.gmra.mxu3 %vm193_vm0, %v635_v19  ;;  %1677 = vmatmul.msk.f32.vlgmr.msrb.gmra.mxu0 %vm193_vm0, %v635_v19 }
 0xaee   :  { %945 = vmatpush.msra.mxu3 %v2221_v1  ;;  %994 = vmatpush.msrb.mxu0 %v2265_v24 }
 0xaf0   :  { %946 = vmatpush.msra.mxu3 %v2227_v3  ;;  %995 = vmatpush.msrb.mxu0 %v2267_v25 }
 0xaf2   :  { %947 = vmatpush.msra.mxu3 %v2231_v5  ;;  %996 = vmatpush.msrb.mxu0 %v2270_v26 }
 0xaf4   :  { %948 = vmatpush.msra.mxu3 %v2237_v7  ;;  %997 = vmatpush.msrb.mxu0 %v2273_v27 }
 0xb6a   :  { %v693_v20 = vpop.f32.mrf.mxu0 }
 0xb6b   :  { %v719_v21 = vadd.f32 %v716_v41, %v693_v20  ;;  %v847_v36 = vadd.f32 %v693_v20, %v2261_v22 }
 0xb6d   :  { %v720_v23 = vadd.f32 %v719_v21, %v2252_v11 }
 0xb6f   :  { %v721_v31 = vsel %vm242_vm1, %v720_v23, -inf }
 0xb70   :  { %722 = vmax.xlane.f32.xlu0 %v721_v31  ;;  %v2445_v62 = vpop.f32.mrf.mxu3 }
 0xb84   :  { %849 = vrot.lane.b32.xlu0 %v847_v36, %s2101_s21 }
 0xbe3   :  { %v723_v37 = vpop.xlane.xlu0 %722 }
 0xbe4   :  { %v724_v38 = vsub.f32 %v720_v23, %v723_v37 }
 0xbe6   :  { %v725_v39 = vmul.f32 1.442695, %v724_v38 }
 0xbe8   :  { %1743 = vpow2.f32 %v725_v39 }
 0xbee   :  { %v1744_v40 = vpop.eup %1743 }
 0xbef   :  { %v727_v42 = vsel %vm242_vm1, %v1744_v40, 0.0 }
 0xbf0   :  { %728 = vadd.xlane.f32.xlu2 %v727_v42 }
 0xc63   :  { %v729_v44 = vpop.xlane.xlu2 %728 }
 0xc64   :  { %1745 = vrcp.f32 %v729_v44  ;;  %v741_v52 = vand.u32 2147483648, %v729_v44  ;;  %v739_v54 = vand.u32 2147483647, %v729_v44  ;;  %vm735_vm5 = vweird.f32 %v729_v44 }
 0xc66   :  { %v742_v57 = vor.u32 1.1754944e-38, %v741_v52  ;;  %vm740_vm7 = vcmp.eq.f32.partialorder %v739_v54, 8.507059e+37 }
 0xc6a   :  { %v1746_v45 = vpop.eup %1745 }
 0xc6b   :  { %v731_v50 = vmul.f32 %v1746_v45, %v729_v44  ;;  %vm736_vm4 = vweird.f32 %v1746_v45 }
 0xc6c   :  { %vm737_vm6 = vmor %vm735_vm5, %vm736_vm4 }
 0xc6d   :  { %v732_v51 = vsub.f32 1.0, %v731_v50 }
 0xc6f   :  { %v733_v53 = vmul.f32 %v1746_v45, %v732_v51 }
 0xc71   :  { %v734_v56 = vadd.f32 %v1746_v45, %v733_v53 }
 0xc73   :  { %v738_v58 = vsel %vm737_vm6, %v1746_v45, %v734_v56  ;;  %v850_v45 = vpop.permute.xlu0 %849 }
 0xc74   :  { %v743_v59 = vsel %vm740_vm7, %v742_v57, %v738_v58 }
 0xc75   :  { %v744_v60 = vmul.f32 %v1744_v40, %v743_v59 }
 0xc77   :  { %1679 = vmatmul.msk.f32.vlgmr.msrb.gmra.mxu2 %vm193_vm0, %v744_v60  ;;  %908 = vst.msk [vmem:[#allocation19 + $0x2] sm:$0x1] %vm242_vm1, %v744_v60 }
 0xc78   :  { %1049 = vmatpush.msrb.mxu2 %v2301_v46 }
 0xc7a   :  { %1050 = vmatpush.msrb.mxu2 %v2303_v47 }
 0xc7c   :  { %1051 = vmatpush.msrb.mxu2 %v2307_v48 }
 0xc7e   :  { %1052 = vmatpush.msrb.mxu2 %v2311_v49 }
 0xcfa   :  { %v765_v61 = vpop.f32.mrf.mxu2 }
 0xcfb   :  { %1680 = vmatmul.msk.f32.vlgmr.msrb.gmra.mxu3 %vm193_vm0, %v765_v61  ;;  %v909_v61 = vld [vmem:[#allocation2 + $0x3] sm:$0x1] }
 0xcfc   :  { %1118 = vmatpush.msrb.mxu3 %v2338_v32 }
 0xcfe   :  { %1119 = vmatpush.msrb.mxu3 %v2340_v33 }
 0xd00   :  { %1120 = vmatpush.msrb.mxu3 %v2344_v34 }
 0xd02   :  { %1121 = vmatpush.msrb.mxu3 %v2348_v35 }
 0xd03   :  { %1685 = vmatmul.msk.f32.vlgmr.msra.gmra.mxu3 %vm193_vm0, %v909_v61 }
 0xd04   :  { %1251 = vmatpush.msra.mxu3 %v2277_v28 }
 0xd06   :  { %1252 = vmatpush.msra.mxu3 %v2279_v29 }
 0xd08   :  { %1253 = vmatpush.msra.mxu3 %v2283_v30 }
 0xd0a   :  { %1254 = vmatpush.msra.mxu3 %v2292_v43 }
 0xd7e   :  { %v788_v63 = vpop.f32.mrf.mxu3 }
 0xd7f   :  { %792 = vrot.lane.b32.xlu1 %v788_v63, %s2101_s21 }
 0xdf1   :  { %v793_v8 = vpop.permute.xlu1 %792 }
 0xdf2   :  { %v795_v9 = vadd.f32 %v793_v8, %v716_v41 }
 0xdf4   :  { %v796_v10 = vadd.f32 %v795_v9, %v2252_v11 }
 0xdf6   :  { %v797_v12 = vmax.f32 %v796_v10, 0.0 }
 0xdf8   :  { %799 = vrot.lane.b32.xlu1 %v797_v12, %s2102_s27 }
 0xe00   :  { %824 = vrot.lane.b32.xlu1 %v693_v20, %s2102_s27 }
 0xe6a   :  { %v800_v13 = vpop.permute.xlu1 %799 }
 0xe6b   :  { %1681 = vmatmul.msk.f32.vlgmr.msra.gmra.mxu0 %vm193_vm0, %v800_v13 }
 0xe6c   :  { %1156 = vmatpush.msra.mxu0 %v2219_v0 }
 0xe6e   :  { %1157 = vmatpush.msra.mxu0 %v2223_v2 }
 0xe70   :  { %1158 = vmatpush.msra.mxu0 %v2229_v4 }
 0xe72   :  { %1159 = vmatpush.msra.mxu0 %v2235_v6  ;;  %v825_v17 = vpop.permute.xlu1 %824 }
 0xee8   :  { %v820_v14 = vpop.f32.mrf.mxu0 }
 0xee9   :  { %v821_v15 = vadd.f32 %v820_v14, %v2332_v55 }
 0xeeb   :  { %v827_v19 = vadd.f32 %v825_v17, %v821_v15 }
 0xeed   :  { %v1682_v41 = vmul.f32 -1.442695, %v827_v19 }
 0xeef   :  { %1747 = vpow2.f32 %v1682_v41 }
 0xef5   :  { %v1748_v21 = vpop.eup %1747 }
 0xef6   :  { %v831_v20 = vadd.f32 1.0, %v1748_v21 }
 0xef8   :  { %1749 = vrcp.f32 %v831_v20  ;;  %v843_v37 = vand.u32 2147483648, %v831_v20  ;;  %v841_v39 = vand.u32 2147483647, %v831_v20  ;;  %vm837_vm9 = vweird.f32 %v831_v20 }
 0xefa   :  { %v844_v42 = vor.u32 1.1754944e-38, %v843_v37  ;;  %vm842_vm11 = vcmp.eq.f32.partialorder %v841_v39, 8.507059e+37 }
 0xefe   :  { %v1750_v23 = vpop.eup %1749 }
 0xeff   :  { %v833_v31 = vmul.f32 %v1750_v23, %v831_v20  ;;  %vm838_vm8 = vweird.f32 %v1750_v23 }
 0xf00   :  { %vm839_vm10 = vmor %vm837_vm9, %vm838_vm8 }
 0xf01   :  { %v834_v36 = vsub.f32 1.0, %v833_v31 }
 0xf03   :  { %v835_v38 = vmul.f32 %v1750_v23, %v834_v36 }
 0xf05   :  { %v836_v40 = vadd.f32 %v1750_v23, %v835_v38 }
 0xf07   :  { %v840_v44 = vsel %vm839_vm10, %v1750_v23, %v836_v40 }
 0xf08   :  { %v845_v50 = vsel %vm842_vm11, %v844_v42, %v840_v44 }
 0xf09   :  { %v852_v51 = vmul.f32 %v850_v45, %v845_v50  ;;  %v859_v56 = vsub.f32 1.0, %v845_v50  ;;  %v865_v58 = vmul.f32 %v845_v50, %v2409_v16  ;;  %v950_v16 = vpop.f32.mrf.mxu3 }
 0xf0b   :  { %854 = vrot.lane.b32.xlu1 %v852_v51, %s2103_s30 }
 0xf7d   :  { %v855_v52 = vpop.permute.xlu1 %854 }
 0xf7e   :  { %v857_v53 = vadd.f32 %v855_v52, %v821_v15 }
 0xf80   :  { %1751 = vtanh.f32 %v857_v53 }
 0xf86   :  { %v1752_v54 = vpop.eup %1751 }
 0xf87   :  { %861 = vrot.lane.b32.xlu1 %v1752_v54, %s2102_s27 }
 0xff9   :  { %v862_v57 = vpop.permute.xlu1 %861 }
 0xffa   :  { %v864_v59 = vmul.f32 %v862_v57, %v859_v56 }
 0xffc   :  { %v2460_v60 = vadd.f32 %v865_v58, %v864_v59 }
 0xffe   :  { %868 = vrot.lane.b32.xlu0 %v2460_v60, %s2102_s27 }
0x1070   :  { %v869_v63 = vpop.permute.xlu0 %868 }
0x1071   :  { %907 = vst.msk [vmem:[#allocation17 + $0x2] sm:$0x1] %vm242_vm1, %v869_v63  ;;  %1683 = vmatmul.msk.f32.vlgmr.msra.gmra.mxu1 %vm193_vm0, %v869_v63  ;;  %1684 = vmatmul.msk.f32.vlgmr.msra.gmra.mxu2 %vm193_vm0, %v869_v63 }
0x1072   :  { %1179 = vmatpush.msra.mxu1 %v2221_v1  ;;  %1228 = vmatpush.msra.mxu2 %v2265_v24 }
0x1074   :  { %1180 = vmatpush.msra.mxu1 %v2227_v3  ;;  %1229 = vmatpush.msra.mxu2 %v2267_v25 }
0x1076   :  { %1181 = vmatpush.msra.mxu1 %v2231_v5  ;;  %1230 = vmatpush.msra.mxu2 %v2270_v26 }
0x1078   :  { %1182 = vmatpush.msra.mxu1 %v2237_v7  ;;  %1231 = vmatpush.msra.mxu2 %v2273_v27 }
0x10ee   :  { %v2494_v40 = vpop.f32.mrf.mxu1 }
0x10f4   :  { %v927_v8 = vpop.f32.mrf.mxu2 }
0x10f5   :  { %v953_v9 = vadd.f32 %v950_v16, %v927_v8  ;;  %v1081_v44 = vadd.f32 %v927_v8, %v2261_v22 }
0x10f7   :  { %v954_v10 = vadd.f32 %v953_v9, %v2252_v11 }
0x10f9   :  { %v955_v1 = vsel %vm242_vm1, %v954_v10, -inf }
0x10fa   :  { %956 = vmax.xlane.f32.xlu2 %v955_v1 }
0x116d   :  { %v957_v12 = vpop.xlane.xlu2 %956 }
0x116e   :  { %v958_v3 = vsub.f32 %v954_v10, %v957_v12 }
0x1170   :  { %v959_v13 = vmul.f32 1.442695, %v958_v3 }
0x1172   :  { %1753 = vpow2.f32 %v959_v13 }
0x1178   :  { %v1754_v14 = vpop.eup %1753 }
0x1179   :  { %v961_v5 = vsel %vm242_vm1, %v1754_v14, 0.0 }
0x117a   :  { %962 = vadd.xlane.f32.xlu1 %v961_v5 }
0x11ed   :  { %v963_v15 = vpop.xlane.xlu1 %962 }
0x11ee   :  { %1755 = vrcp.f32 %v963_v15  ;;  %v975_v41 = vand.u32 2147483648, %v963_v15  ;;  %v973_v20 = vand.u32 2147483647, %v963_v15  ;;  %vm969_vm13 = vweird.f32 %v963_v15 }
0x11f0   :  { %v976_v31 = vor.u32 1.1754944e-38, %v975_v41  ;;  %vm974_vm15 = vcmp.eq.f32.partialorder %v973_v20, 8.507059e+37 }
0x11f4   :  { %v1756_v7 = vpop.eup %1755 }
0x11f5   :  { %v965_v17 = vmul.f32 %v1756_v7, %v963_v15  ;;  %vm970_vm12 = vweird.f32 %v1756_v7 }
0x11f6   :  { %vm971_vm14 = vmor %vm969_vm13, %vm970_vm12 }
0x11f7   :  { %v966_v19 = vsub.f32 1.0, %v965_v17 }
0x11f9   :  { %v967_v21 = vmul.f32 %v1756_v7, %v966_v19 }
0x11fb   :  { %v968_v23 = vadd.f32 %v1756_v7, %v967_v21  ;;  %v1143_v21 = vld [vmem:[#allocation2 + $0x4] sm:$0x1] }
0x11fd   :  { %v972_v36 = vsel %vm971_vm14, %v1756_v7, %v968_v23  ;;  %v1808_v23 = vld [vmem:[#allocation10 + $0x10] sm:$0xff]  ;;  %vm423_vm14 = vcmask 1040384  }
0x11fe   :  { %v977_v37 = vsel %vm974_vm15, %v976_v31, %v972_v36  ;;  %v2530_v36 = vld [vmem:[%s2659_s9] sm:$0x1] }
0x11ff   :  { %v978_v38 = vmul.f32 %v1754_v14, %v977_v37 }
0x1201   :  { %1686 = vmatmul.msk.f32.vlgmr.msrb.gmra.mxu0 %vm193_vm0, %v978_v38  ;;  %1142 = vst.msk [vmem:[#allocation19 + $0x3] sm:$0x1] %vm242_vm1, %v978_v38 }
0x1202   :  { %1283 = vmatpush.msrb.mxu0 %v2301_v46 }
0x1204   :  { %1284 = vmatpush.msrb.mxu0 %v2303_v47 }
0x1206   :  { %1285 = vmatpush.msrb.mxu0 %v2307_v48 }
0x1208   :  { %1286 = vmatpush.msrb.mxu0 %v2311_v49 }
0x127e   :  { %v999_v39 = vpop.f32.mrf.mxu0 }
0x127f   :  { %1687 = vmatmul.msk.f32.vlgmr.msrb.gmra.mxu1 %vm193_vm0, %v999_v39 }
0x1280   :  { %1352 = vmatpush.msrb.mxu1 %v2338_v32 }
0x1282   :  { %1353 = vmatpush.msrb.mxu1 %v2340_v33 }
0x1284   :  { %1354 = vmatpush.msrb.mxu1 %v2344_v34 }
0x1286   :  { %1355 = vmatpush.msrb.mxu1 %v2348_v35 }
0x1287   :  { %1692 = vmatmul.msk.f32.vlgmr.msra.gmra.mxu1 %vm193_vm0, %v1143_v21 }
0x1288   :  { %1485 = vmatpush.msra.mxu1 %v2277_v28  ;;  %v1809_v28 = vld [vmem:[#allocation10 + $0x8] sm:$0xff] }
0x128a   :  { %1486 = vmatpush.msra.mxu1 %v2279_v29  ;;  %v1810_v29 = vld [vmem:[#allocation10] sm:$0xff] }
0x128c   :  { %1487 = vmatpush.msra.mxu1 %v2283_v30 }
0x128e   :  { %1488 = vmatpush.msra.mxu1 %v2292_v43 }
0x12fc   :  { %v1022_v42 = vpop.f32.mrf.mxu1 }
0x12fd   :  { %1026 = vrot.lane.b32.xlu0 %v1022_v42, %s2101_s21 }
0x1304   :  { %v1184_v30 = vpop.f32.mrf.mxu1 }
0x1305   :  { %1058 = vrot.lane.b32.xlu0 %v927_v8, %s2102_s27 }
0x130d   :  { %1083 = vrot.lane.b32.xlu0 %v1081_v44, %s2101_s21 }
0x136f   :  { %v1027_v45 = vpop.permute.xlu0 %1026 }
0x1370   :  { %v1029_v50 = vadd.f32 %v1027_v45, %v950_v16 }
0x1372   :  { %v1030_v51 = vadd.f32 %v1029_v50, %v2252_v11 }
0x1374   :  { %v1031_v52 = vmax.f32 %v1030_v51, 0.0 }
0x1376   :  { %1033 = vrot.lane.b32.xlu2 %v1031_v52, %s2102_s27 }
0x1377   :  { %v1059_v57 = vpop.permute.xlu0 %1058 }
0x137f   :  { %v1084_v1 = vpop.permute.xlu0 %1083 }
0x13d0   :  { %v1034_v53 = vpop.permute.xlu2 %1033 }
0x13d1   :  { %1688 = vmatmul.msk.f32.vlgmr.msrb.gmra.mxu2 %vm193_vm0, %v1034_v53 }
0x13d2   :  { %1390 = vmatpush.msrb.mxu2 %v2219_v0 }
0x13d4   :  { %1391 = vmatpush.msrb.mxu2 %v2223_v2 }
0x13d6   :  { %1392 = vmatpush.msrb.mxu2 %v2229_v4 }
0x13d8   :  { %1393 = vmatpush.msrb.mxu2 %v2235_v6 }
0x1454   :  { %v1054_v54 = vpop.f32.mrf.mxu2 }
0x1455   :  { %v1055_v56 = vadd.f32 %v1054_v54, %v2332_v55 }
0x1457   :  { %v1061_v58 = vadd.f32 %v1059_v57, %v1055_v56 }
0x1459   :  { %v1689_v11 = vmul.f32 -1.442695, %v1061_v58 }
0x145b   :  { %1757 = vpow2.f32 %v1689_v11 }
0x1461   :  { %v1758_v59 = vpop.eup %1757 }
0x1462   :  { %v1065_v61 = vadd.f32 1.0, %v1758_v59 }
0x1464   :  { %1759 = vrcp.f32 %v1065_v61  ;;  %v1077_v0 = vand.u32 2147483648, %v1065_v61  ;;  %v1075_v2 = vand.u32 2147483647, %v1065_v61  ;;  %vm1071_vm3 = vweird.f32 %v1065_v61 }
0x1466   :  { %v1078_v6 = vor.u32 1.1754944e-38, %v1077_v0  ;;  %vm1076_vm5 = vcmp.eq.f32.partialorder %v1075_v2, 8.507059e+37 }
0x146a   :  { %v1760_v63 = vpop.eup %1759 }
0x146b   :  { %v1067_v16 = vmul.f32 %v1760_v63, %v1065_v61  ;;  %vm1072_vm2 = vweird.f32 %v1760_v63 }
0x146c   :  { %vm1073_vm4 = vmor %vm1071_vm3, %vm1072_vm2 }
0x146d   :  { %v1068_v8 = vsub.f32 1.0, %v1067_v16 }
0x146f   :  { %v1069_v9 = vmul.f32 %v1760_v63, %v1068_v8 }
0x1471   :  { %v1070_v4 = vadd.f32 %v1760_v63, %v1069_v9 }
0x1473   :  { %v1074_v10 = vsel %vm1073_vm4, %v1760_v63, %v1070_v4 }
0x1474   :  { %v1079_v12 = vsel %vm1076_vm5, %v1078_v6, %v1074_v10 }
0x1475   :  { %v1086_v3 = vmul.f32 %v1084_v1, %v1079_v12  ;;  %v1093_v15 = vsub.f32 1.0, %v1079_v12  ;;  %v1099_v17 = vmul.f32 %v1079_v12, %v2460_v60  ;;  %v1807_v60 = vld [vmem:[#allocation10 + $0x18] sm:$0xff] }
0x1477   :  { %1088 = vrot.lane.b32.xlu0 %v1086_v3, %s2103_s30 }
0x14e9   :  { %v1089_v13 = vpop.permute.xlu0 %1088 }
0x14ea   :  { %v1091_v14 = vadd.f32 %v1089_v13, %v1055_v56 }
0x14ec   :  { %1761 = vtanh.f32 %v1091_v14 }
0x14f2   :  { %v1762_v5 = vpop.eup %1761 }
0x14f3   :  { %1095 = vrot.lane.b32.xlu2 %v1762_v5, %s2102_s27 }
0x154d   :  { %v1096_v7 = vpop.permute.xlu2 %1095 }
0x154e   :  { %v1098_v19 = vmul.f32 %v1096_v7, %v1093_v15 }
0x1550   :  { %v2511_v41 = vadd.f32 %v1099_v17, %v1098_v19 }
0x1552   :  { %1102 = vrot.lane.b32.xlu0 %v2511_v41, %s2102_s27 }
0x15c4   :  { %v1103_v20 = vpop.permute.xlu0 %1102 }
0x15c5   :  { %1141 = vst.msk [vmem:[#allocation17 + $0x3] sm:$0x1] %vm242_vm1, %v1103_v20  ;;  %1690 = vmatmul.msk.f32.vlgmr.msrb.gmra.mxu3 %vm193_vm0, %v1103_v20  ;;  %1691 = vmatmul.msk.f32.vlgmr.msra.gmra.mxu0 %vm193_vm0, %v1103_v20 }
0x15c6   :  { %1413 = vmatpush.msrb.mxu3 %v1807_v60  ;;  %1462 = vmatpush.msra.mxu0 %v2265_v24 }
0x15c8   :  { %1414 = vmatpush.msrb.mxu3 %v1808_v23  ;;  %1463 = vmatpush.msra.mxu0 %v2267_v25 }
0x15ca   :  { %1415 = vmatpush.msrb.mxu3 %v1809_v28  ;;  %1464 = vmatpush.msra.mxu0 %v2270_v26 }
0x15cc   :  { %1416 = vmatpush.msrb.mxu3 %v1810_v29  ;;  %1465 = vmatpush.msra.mxu0 %v2273_v27 }
0x1642   :  { %v1161_v43 = vpop.f32.mrf.mxu0 }
0x1643   :  { %v1187_v31 = vadd.f32 %v1184_v30, %v1161_v43 }
0x1645   :  { %v1188_v24 = vadd.f32 %v2530_v36, %v1187_v31 }
0x1647   :  { %v1189_v25 = vsel %vm242_vm1, %v1188_v24, -inf }
0x1648   :  { %1190 = vmax.xlane.f32.xlu2 %v1189_v25  ;;  %v2546_v61 = vpop.f32.mrf.mxu3 }
0x16bb   :  { %v1191_v37 = vpop.xlane.xlu2 %1190 }
0x16bc   :  { %v1192_v38 = vsub.f32 %v1188_v24, %v1191_v37 }
0x16be   :  { %v1193_v26 = vmul.f32 1.442695, %v1192_v38 }
0x16c0   :  { %1763 = vpow2.f32 %v1193_v26 }
0x16c6   :  { %v1764_v39 = vpop.eup %1763 }
0x16c7   :  { %v1195_v27 = vsel %vm242_vm1, %v1764_v39, 0.0 }
0x16c8   :  { %1196 = vadd.xlane.f32.xlu1 %v1195_v27 }
0x173b   :  { %v1197_v42 = vpop.xlane.xlu1 %1196 }
0x173c   :  { %1765 = vrcp.f32 %v1197_v42  ;;  %v1209_v51 = vand.u32 2147483648, %v1197_v42  ;;  %v1207_v53 = vand.u32 2147483647, %v1197_v42  ;;  %vm1203_vm7 = vweird.f32 %v1197_v42 }
0x173e   :  { %v1210_v56 = vor.u32 1.1754944e-38, %v1209_v51  ;;  %vm1208_vm9 = vcmp.eq.f32.partialorder %v1207_v53, 8.507059e+37 }
0x1742   :  { %v1766_v44 = vpop.eup %1765 }
0x1743   :  { %v1199_v45 = vmul.f32 %v1766_v44, %v1197_v42  ;;  %vm1204_vm6 = vweird.f32 %v1766_v44 }
0x1744   :  { %vm1205_vm8 = vmor %vm1203_vm7, %vm1204_vm6 }
0x1745   :  { %v1200_v50 = vsub.f32 1.0, %v1199_v45 }
0x1747   :  { %v1201_v52 = vmul.f32 %v1766_v44, %v1200_v50 }
0x1749   :  { %v1202_v54 = vadd.f32 %v1766_v44, %v1201_v52 }
0x174b   :  { %v1206_v57 = vsel %vm1205_vm8, %v1766_v44, %v1202_v54  ;;  %v2573_v44 = vld [vmem:[%s2660_s10] sm:$0x1] }
0x174c   :  { %v1211_v58 = vsel %vm1208_vm9, %v1210_v56, %v1206_v57  ;;  %v2577_v45 = vadd.f32 %v2445_v62, %v2573_v44  ;;  %v2583_v51 = vadd.f32 %v2546_v61, %v2573_v44 }
0x174d   :  { %v1212_v11 = vmul.f32 %v1764_v39, %v1211_v58 }
0x174e   :  { %v658_v50 = vsel %vm423_vm14, %v2577_v45, -inf  ;;  %v1126_v52 = vsel %vm423_vm14, %v2583_v51, -inf }
0x174f   :  { %1693 = vmatmul.msk.f32.vlgmr.msra.gmra.mxu2 %vm193_vm0, %v1212_v11  ;;  %1376 = vst.msk [vmem:[#allocation19 + $0x4] sm:$0x1] %vm242_vm1, %v1212_v11 }
0x1750   :  { %1517 = vmatpush.msra.mxu2 %v2301_v46 }
0x1752   :  { %1518 = vmatpush.msra.mxu2 %v2303_v47  ;;  %v1315_v47 = vadd.f32 %v1161_v43, %v2261_v22 }
0x1754   :  { %1519 = vmatpush.msra.mxu2 %v2307_v48 }
0x1756   :  { %1520 = vmatpush.msra.mxu2 %v2311_v49 }
0x17d2   :  { %v1233_v59 = vpop.f32.mrf.mxu2 }
0x17d3   :  { %1694 = vmatmul.msk.f32.vlgmr.msra.gmra.mxu3 %vm193_vm0, %v1233_v59 }
0x17d4   :  { %1586 = vmatpush.msra.mxu3 %v2338_v32 }
0x17d6   :  { %1587 = vmatpush.msra.mxu3 %v2340_v33 }
0x17d8   :  { %1588 = vmatpush.msra.mxu3 %v2344_v34 }
0x17da   :  { %1589 = vmatpush.msra.mxu3 %v2348_v35 }
0x1856   :  { %v1256_v46 = vpop.f32.mrf.mxu3 }
0x1857   :  { %1260 = vrot.lane.b32.xlu0 %v1256_v46, %s2101_s21 }
0x185f   :  { %1292 = vrot.lane.b32.xlu0 %v1161_v43, %s2102_s27 }
0x1867   :  { %1317 = vrot.lane.b32.xlu0 %v1315_v47, %s2101_s21 }
0x18c9   :  { %v1261_v48 = vpop.permute.xlu0 %1260 }
0x18ca   :  { %v1263_v49 = vadd.f32 %v1261_v48, %v1184_v30  ;;  %v1377_v30 = vld [vmem:[#allocation2 + $0x5] sm:$0x1] }
0x18cb   :  { %1699 = vmatmul.msk.f32.vlgmr.msrb.gmra.mxu3 %vm193_vm0, %v1377_v30 }
0x18cc   :  { %v1264_v32 = vadd.f32 %v2530_v36, %v1263_v49 }
0x18ce   :  { %v1265_v33 = vmax.f32 %v1264_v32, 0.0 }
0x18d0   :  { %1267 = vrot.lane.b32.xlu1 %v1265_v33, %s2102_s27 }
0x18d1   :  { %v1293_v16 = vpop.permute.xlu0 %1292 }
0x1942   :  { %v1268_v34 = vpop.permute.xlu1 %1267 }
0x1943   :  { %1695 = vmatmul.msk.f32.vlgmr.msrb.gmra.mxu0 %vm193_vm0, %v1268_v34 }
0x194e   :  { %v1418_v31 = vpop.f32.mrf.mxu3 }
0x19c0   :  { %v1288_v35 = vpop.f32.mrf.mxu0 }
0x19c1   :  { %v1289_v63 = vadd.f32 %v1288_v35, %v2332_v55  ;;  %v1318_v55 = vpop.permute.xlu0 %1317 }
0x19c3   :  { %v1295_v8 = vadd.f32 %v1293_v16, %v1289_v63 }
0x19c5   :  { %v1696_v0 = vmul.f32 -1.442695, %v1295_v8 }
0x19c7   :  { %1767 = vpow2.f32 %v1696_v0 }
0x19cd   :  { %v1768_v9 = vpop.eup %1767 }
0x19ce   :  { %v1299_v2 = vadd.f32 1.0, %v1768_v9 }
0x19d0   :  { %1769 = vrcp.f32 %v1299_v2  ;;  %v1311_v1 = vand.u32 2147483648, %v1299_v2  ;;  %v1309_v3 = vand.u32 2147483647, %v1299_v2  ;;  %vm1305_vm11 = vweird.f32 %v1299_v2 }
0x19d2   :  { %v1312_v14 = vor.u32 1.1754944e-38, %v1311_v1  ;;  %vm1310_vm13 = vcmp.eq.f32.partialorder %v1309_v3, 8.507059e+37 }
0x19d6   :  { %v1770_v4 = vpop.eup %1769 }
0x19d7   :  { %v1301_v6 = vmul.f32 %v1770_v4, %v1299_v2  ;;  %vm1306_vm10 = vweird.f32 %v1770_v4 }
0x19d8   :  { %vm1307_vm12 = vmor %vm1305_vm11, %vm1306_vm10 }
0x19d9   :  { %v1302_v10 = vsub.f32 1.0, %v1301_v6  ;;  %v1812_v6 = vld [vmem:[%s2658_s8] sm:$0x1]  ;;  %s2104_s8 = smov [#allocation17]  }
0x19da   :  { %s1627_s17 = sshll.u32 %s2104_s8, 4  ;;  %s1628_s17 = int_to_ptr.vmem [resolvable:$true] %s1627_s17 }
0x19db   :  { %v1303_v12 = vmul.f32 %v1770_v4, %v1302_v10 }
0x19dd   :  { %v1304_v13 = vadd.f32 %v1770_v4, %v1303_v12 }
0x19df   :  { %v1308_v5 = vsel %vm1307_vm12, %v1770_v4, %v1304_v13 }
0x19e0   :  { %v1313_v15 = vsel %vm1310_vm13, %v1312_v14, %v1308_v5 }
0x19e1   :  { %v1320_v7 = vmul.f32 %v1318_v55, %v1313_v15  ;;  %v1327_v20 = vsub.f32 1.0, %v1313_v15  ;;  %v1333_v23 = vmul.f32 %v1313_v15, %v2511_v41 }
0x19e3   :  { %1322 = vrot.lane.b32.xlu0 %v1320_v7, %s2103_s30 }
0x1a55   :  { %v1323_v17 = vpop.permute.xlu0 %1322 }
0x1a56   :  { %v1325_v19 = vadd.f32 %v1323_v17, %v1289_v63 }
0x1a58   :  { %1771 = vtanh.f32 %v1325_v19 }
0x1a5e   :  { %v1772_v21 = vpop.eup %1771 }
0x1a5f   :  { %1329 = vrot.lane.b32.xlu1 %v1772_v21, %s2102_s27 }
0x1ad1   :  { %v1330_v60 = vpop.permute.xlu1 %1329 }
0x1ad2   :  { %v1332_v28 = vmul.f32 %v1330_v60, %v1327_v20 }
0x1ad4   :  { %v2559_v29 = vadd.f32 %v1333_v23, %v1332_v28 }
0x1ad6   :  { %1336 = vrot.lane.b32.xlu0 %v2559_v29, %s2102_s27 }
0x1b48   :  { %v1337_v43 = vpop.permute.xlu0 %1336 }
0x1b49   :  { %1375 = vst.msk [vmem:[#allocation17 + $0x4] sm:$0x1] %vm242_vm1, %v1337_v43  ;;  %1697 = vmatmul.msk.f32.vlgmr.msrb.gmra.mxu1 %vm193_vm0, %v1337_v43  ;;  %1698 = vmatmul.msk.f32.vlgmr.msrb.gmra.mxu2 %vm193_vm0, %v1337_v43 }
0x1bc6   :  { %v1357_v53 = vpop.f32.mrf.mxu1 }
0x1bc7   :  { %v2588_v54 = vadd.f32 %v1357_v53, %v2573_v44 }
0x1bc9   :  { %v1360_v62 = vsel %vm423_vm14, %v2588_v54, -inf }
0x1bcc   :  { %v1395_v24 = vpop.f32.mrf.mxu2 }
0x1bcd   :  { %v1421_v25 = vadd.f32 %v1418_v31, %v1395_v24  ;;  %v1549_v63 = vadd.f32 %v1395_v24, %v2261_v22 }
0x1bcf   :  { %v1422_v41 = vadd.f32 %v2530_v36, %v1421_v25 }
0x1bd1   :  { %v1423_v37 = vsel %vm242_vm1, %v1422_v41, -inf }
0x1bd2   :  { %1424 = vmax.xlane.f32.xlu2 %v1423_v37  ;;  %v2610_v37 = vadd.f32 %v2392_v18, %v2573_v44 }
0x1c45   :  { %v1425_v38 = vpop.xlane.xlu2 %1424 }
0x1c46   :  { %v1426_v26 = vsub.f32 %v1422_v41, %v1425_v38 }
0x1c48   :  { %v1427_v39 = vmul.f32 1.442695, %v1426_v26 }
0x1c4a   :  { %1773 = vpow2.f32 %v1427_v39  ;;  %v424_v39 = vsel %vm423_vm14, %v2610_v37, -inf }
0x1c50   :  { %v1774_v27 = vpop.eup %1773 }
0x1c51   :  { %v1429_v42 = vsel %vm242_vm1, %v1774_v27, 0.0 }
0x1c52   :  { %1430 = vadd.xlane.f32.xlu1 %v1429_v42 }
0x1c5a   :  { %659 = vmax.xlane.f32.xlu1 %v658_v50 }
0x1c62   :  { %1127 = vmax.xlane.f32.xlu1 %v1126_v52 }
0x1c6a   :  { %1361 = vmax.xlane.f32.xlu1 %v1360_v62 }
0x1cc5   :  { %v1431_v56 = vpop.xlane.xlu1 %1430 }
0x1cc6   :  { %1775 = vrcp.f32 %v1431_v56  ;;  %v1443_v59 = vand.u32 2147483648, %v1431_v56  ;;  %v1441_v46 = vand.u32 2147483647, %v1431_v56  ;;  %vm1437_vm2 = vweird.f32 %v1431_v56 }
0x1cc8   :  { %v1444_v48 = vor.u32 1.1754944e-38, %v1443_v59  ;;  %vm1442_vm4 = vcmp.eq.f32.partialorder %v1441_v46, 8.507059e+37 }
0x1ccc   :  { %v1776_v57 = vpop.eup %1775 }
0x1ccd   :  { %v1433_v58 = vmul.f32 %v1776_v57, %v1431_v56  ;;  %vm1438_vm15 = vweird.f32 %v1776_v57 }
0x1cce   :  { %vm1439_vm3 = vmor %vm1437_vm2, %vm1438_vm15 }
0x1ccf   :  { %v1434_v11 = vsub.f32 1.0, %v1433_v58 }
0x1cd1   :  { %v1435_v61 = vmul.f32 %v1776_v57, %v1434_v11 }
0x1cd3   :  { %v1436_v47 = vadd.f32 %v1776_v57, %v1435_v61  ;;  %v2622_v61 = vadd.f32 %v2494_v40, %v2573_v44 }
0x1cd5   :  { %v1440_v49 = vsel %vm1439_vm3, %v1776_v57, %v1436_v47  ;;  %v892_v46 = vsel %vm423_vm14, %v2622_v61, -inf }
0x1cd6   :  { %v1445_v32 = vsel %vm1442_vm4, %v1444_v48, %v1440_v49 }
0x1cd7   :  { %v1446_v33 = vmul.f32 %v1774_v27, %v1445_v32 }
0x1cd9   :  { %1700 = vmatmul.msk.f32.vlgmr.msra.gmra.mxu0 %vm193_vm0, %v1446_v33  ;;  %1610 = vst.msk [vmem:[#allocation19 + $0x5] sm:$0x1] %vm242_vm1, %v1446_v33 }
0x1d56   :  { %v1467_v34 = vpop.f32.mrf.mxu0 }
0x1d57   :  { %1701 = vmatmul.msk.f32.vlgmr.msra.gmra.mxu1 %vm193_vm0, %v1467_v34 }
0x1dd4   :  { %v1490_v35 = vpop.f32.mrf.mxu1 }
0x1dd5   :  { %1494 = vrot.lane.b32.xlu0 %v1490_v35, %s2101_s21 }
0x1ddd   :  { %1526 = vrot.lane.b32.xlu0 %v1395_v24, %s2102_s27 }
0x1de5   :  { %1551 = vrot.lane.b32.xlu0 %v1549_v63, %s2101_s21 }
0x1e47   :  { %v1495_v16 = vpop.permute.xlu0 %1494 }
0x1e48   :  { %v1497_v8 = vadd.f32 %v1495_v16, %v1418_v31  ;;  %v660_v31 = vpop.xlane.xlu1 %659 }
0x1e49   :  { %v661_v25 = vsub.f32 %v2577_v45, %v660_v31 }
0x1e4a   :  { %v1498_v0 = vadd.f32 %v2530_v36, %v1497_v8 }
0x1e4b   :  { %v662_v41 = vmul.f32 1.442695, %v661_v25 }
0x1e4c   :  { %v1499_v9 = vmax.f32 %v1498_v0, 0.0 }
0x1e4e   :  { %1501 = vrot.lane.b32.xlu2 %v1499_v9, %s2102_s27 }
0x1e4f   :  { %v1527_v1 = vpop.permute.xlu0 %1526 }
0x1e50   :  { %v1128_v24 = vpop.xlane.xlu1 %1127 }
0x1e51   :  { %v1129_v11 = vsub.f32 %v2583_v51, %v1128_v24 }
0x1e53   :  { %v1130_v59 = vmul.f32 1.442695, %v1129_v11 }
0x1e57   :  { %v1552_v20 = vpop.permute.xlu0 %1551 }
0x1e58   :  { %v1362_v38 = vpop.xlane.xlu1 %1361 }
0x1e59   :  { %v1363_v26 = vsub.f32 %v2588_v54, %v1362_v38 }
0x1e5b   :  { %v1364_v27 = vmul.f32 1.442695, %v1363_v26 }
0x1ea8   :  { %v1502_v2 = vpop.permute.xlu2 %1501 }
0x1ea9   :  { %1702 = vmatmul.msk.f32.vlgmr.msra.gmra.mxu2 %vm193_vm0, %v1502_v2 }
0x1f2c   :  { %v1522_v4 = vpop.f32.mrf.mxu2 }
0x1f2d   :  { %v1523_v10 = vadd.f32 %v1812_v6, %v1522_v4 }
0x1f2f   :  { %v1529_v22 = vadd.f32 %v1527_v1, %v1523_v10 }
0x1f31   :  { %v1703_v12 = vmul.f32 -1.442695, %v1529_v22 }
0x1f33   :  { %1777 = vpow2.f32 %v1703_v12 }
0x1f39   :  { %v1778_v3 = vpop.eup %1777 }
0x1f3a   :  { %v1533_v13 = vadd.f32 1.0, %v1778_v3 }
0x1f3c   :  { %1779 = vrcp.f32 %v1533_v13  ;;  %v1545_v55 = vand.u32 2147483648, %v1533_v13  ;;  %v1543_v7 = vand.u32 2147483647, %v1533_v13  ;;  %vm1539_vm6 = vweird.f32 %v1533_v13 }
0x1f3e   :  { %v1546_v19 = vor.u32 1.1754944e-38, %v1545_v55  ;;  %vm1544_vm8 = vcmp.eq.f32.partialorder %v1543_v7, 8.507059e+37 }
0x1f42   :  { %v1780_v36 = vpop.eup %1779 }
0x1f43   :  { %v1535_v14 = vmul.f32 %v1780_v36, %v1533_v13  ;;  %vm1540_vm5 = vweird.f32 %v1780_v36 }
0x1f44   :  { %vm1541_vm7 = vmor %vm1539_vm6, %vm1540_vm5 }
0x1f45   :  { %v1536_v5 = vsub.f32 1.0, %v1535_v14 }
0x1f47   :  { %v1537_v15 = vmul.f32 %v1780_v36, %v1536_v5 }
0x1f49   :  { %v1538_v17 = vadd.f32 %v1780_v36, %v1537_v15 }
0x1f4b   :  { %v1542_v21 = vsel %vm1541_vm7, %v1780_v36, %v1538_v17 }
0x1f4c   :  { %v1547_v60 = vsel %vm1544_vm8, %v1546_v19, %v1542_v21 }
0x1f4d   :  { %v1554_v23 = vmul.f32 %v1552_v20, %v1547_v60  ;;  %v1561_v18 = vsub.f32 1.0, %v1547_v60  ;;  %v1567_v56 = vmul.f32 %v1547_v60, %v2559_v29 }
0x1f4f   :  { %1556 = vrot.lane.b32.xlu0 %v1554_v23, %s2103_s30 }
0x1fc1   :  { %v1557_v28 = vpop.permute.xlu0 %1556 }
0x1fc2   :  { %v1559_v30 = vadd.f32 %v1557_v28, %v1523_v10 }
0x1fc4   :  { %1781 = vtanh.f32 %v1559_v30 }
0x1fc5   :  { %1783 = vpow2.f32 %v662_v41 }
0x1fc6   :  { %1785 = vpow2.f32 %v1364_v27 }
0x1fc7   :  { %1787 = vpow2.f32 %v1130_v59 }
0x1fca   :  { %v1782_v43 = vpop.eup %1781 }
0x1fcb   :  { %1563 = vrot.lane.b32.xlu2 %v1782_v43, %s2102_s27  ;;  %v1784_v42 = vpop.eup %1783 }
0x1fcc   :  { %v664_v50 = vsel %vm423_vm14, %v1784_v42, 0.0  ;;  %v1786_v52 = vpop.eup %1785 }
0x1fcd   :  { %v1366_v53 = vsel %vm423_vm14, %v1786_v52, 0.0  ;;  %v1788_v47 = vpop.eup %1787 }
0x1fce   :  { %v1132_v48 = vsel %vm423_vm14, %v1788_v47, 0.0 }
0x1ff4   :  { %425 = vmax.xlane.f32.xlu2 %v424_v39 }
0x1ffc   :  { %665 = vadd.xlane.f32.xlu2 %v664_v50 }
0x2004   :  { %1367 = vadd.xlane.f32.xlu2 %v1366_v53 }
0x2025   :  { %v1564_v62 = vpop.permute.xlu2 %1563 }
0x2026   :  { %v1566_v57 = vmul.f32 %v1564_v62, %v1561_v18 }
0x2028   :  { %v1568_v58 = vadd.f32 %v1567_v56, %v1566_v57 }
0x202a   :  { %1570 = vrot.lane.b32.xlu0 %v1568_v58, %s2102_s27 }
0x2054   :  { %893 = vmax.xlane.f32.xlu0 %v892_v46 }
0x205c   :  { %1133 = vadd.xlane.f32.xlu0 %v1132_v48 }
0x2067   :  { %v426_v29 = vpop.xlane.xlu2 %425 }
0x2068   :  { %v427_v22 = vsub.f32 %v2610_v37, %v426_v29 }
0x206a   :  { %v428_v12 = vmul.f32 1.442695, %v427_v22 }
0x206f   :  { %v666_v49 = vpop.xlane.xlu2 %665 }
0x2070   :  { %1789 = vlog2.f32 %v666_v49 }
0x2076   :  { %v1790_v32 = vpop.eup %1789 }
0x2077   :  { %v668_v33 = vmul.f32 0.6931472, %v1790_v32  ;;  %v1368_v34 = vpop.xlane.xlu2 %1367 }
0x2078   :  { %1791 = vlog2.f32 %v1368_v34 }
0x2079   :  { %v669_v35 = vadd.f32 %v668_v33, %v660_v31 }
0x207b   :  { %v670_v40 = vsub.f32 %v2577_v45, %v669_v35 }
0x207d   :  { %671 = vst [vmem:[#allocation16 + $0x1] sm:$0x1] %v670_v40 }
0x207e   :  { %v1792_v63 = vpop.eup %1791 }
0x207f   :  { %v1370_v16 = vmul.f32 0.6931472, %v1792_v63 }
0x2081   :  { %v1371_v8 = vadd.f32 %v1370_v16, %v1362_v38 }
0x2083   :  { %v1372_v0 = vsub.f32 %v2588_v54, %v1371_v8 }
0x2085   :  { %1373 = vst [vmem:[#allocation16 + $0x4] sm:$0x1] %v1372_v0 }
0x209c   :  { %v1571_v9 = vpop.permute.xlu0 %1570 }
0x209d   :  { %1609 = vst.msk [vmem:[#allocation17 + $0x5] sm:$0x1] %vm242_vm1, %v1571_v9  ;;  %1704 = vmatmul.msk.f32.vlgmr.msra.gmra.mxu3 %vm193_vm0, %v1571_v9 }
0x209e   :  { %1632 = dma.vmem_to_hbm [thread:$0]  %s1628_s17, 128, %s1630_s20, [#allocation18]  }
0x209f   :  { %1643 = dma.vmem_to_hbm [thread:$0]  %s1639_s4, 128, %s1641_s24, [#allocation18]  }
0x20c7   :  { %v894_v2 = vpop.xlane.xlu0 %893 }
0x20c8   :  { %v895_v13 = vsub.f32 %v2622_v61, %v894_v2 }
0x20ca   :  { %v896_v14 = vmul.f32 1.442695, %v895_v13 }
0x20cf   :  { %v1134_v4 = vpop.xlane.xlu0 %1133 }
0x20d0   :  { %1793 = vlog2.f32 %v1134_v4 }
0x20d1   :  { %1795 = vpow2.f32 %v428_v12 }
0x20d2   :  { %1797 = vpow2.f32 %v896_v14 }
0x20d6   :  { %v1794_v6 = vpop.eup %1793 }
0x20d7   :  { %v1136_v10 = vmul.f32 0.6931472, %v1794_v6  ;;  %v1796_v5 = vpop.eup %1795 }
0x20d8   :  { %v430_v55 = vsel %vm423_vm14, %v1796_v5, 0.0 }
0x20d9   :  { %v1137_v1 = vadd.f32 %v1136_v10, %v1128_v24 }
0x20db   :  { %v1138_v45 = vsub.f32 %v2583_v51, %v1137_v1  ;;  %v1798_v51 = vpop.eup %1797 }
0x20dc   :  { %v898_v15 = vsel %vm423_vm14, %v1798_v51, 0.0 }
0x20dd   :  { %1139 = vst [vmem:[#allocation16 + $0x3] sm:$0x1] %v1138_v45 }
0x2120   :  { %v1591_v3 = vpop.f32.mrf.mxu3 }
0x2121   :  { %v1592_v54 = vadd.f32 %v1591_v3, %v2573_v44 }
0x2123   :  { %v1594_v36 = vsel %vm423_vm14, %v1592_v54, -inf }
0x2124   :  { %1595 = vmax.xlane.f32.xlu1 %v1594_v36 }
0x212c   :  { %431 = vadd.xlane.f32.xlu1 %v430_v55 }
0x2134   :  { %899 = vadd.xlane.f32.xlu1 %v898_v15 }
0x2197   :  { %v1596_v7 = vpop.xlane.xlu1 %1595 }
0x2198   :  { %v1597_v17 = vsub.f32 %v1592_v54, %v1596_v7 }
0x219a   :  { %v1598_v19 = vmul.f32 1.442695, %v1597_v17 }
0x219c   :  { %1799 = vpow2.f32 %v1598_v19 }
0x219f   :  { %v432_v44 = vpop.xlane.xlu1 %431 }
0x21a0   :  { %1801 = vlog2.f32 %v432_v44 }
0x21a2   :  { %v1800_v21 = vpop.eup %1799 }
0x21a3   :  { %v1600_v20 = vsel %vm423_vm14, %v1800_v21, 0.0 }
0x21a4   :  { %1601 = vadd.xlane.f32.xlu1 %v1600_v20 }
0x21a6   :  { %v1802_v60 = vpop.eup %1801 }
0x21a7   :  { %v434_v23 = vmul.f32 0.6931472, %v1802_v60  ;;  %v900_v28 = vpop.xlane.xlu1 %899 }
0x21a8   :  { %1803 = vlog2.f32 %v900_v28 }
0x21a9   :  { %v435_v30 = vadd.f32 %v434_v23, %v426_v29 }
0x21ab   :  { %v436_v43 = vsub.f32 %v2610_v37, %v435_v30 }
0x21ad   :  { %437 = vst [vmem:[#allocation16] sm:$0x1] %v436_v43 }
0x21ae   :  { %v1804_v31 = vpop.eup %1803 }
0x21af   :  { %v902_v24 = vmul.f32 0.6931472, %v1804_v31 }
0x21b1   :  { %v903_v25 = vadd.f32 %v902_v24, %v894_v2 }
0x21b3   :  { %v904_v41 = vsub.f32 %v2622_v61, %v903_v25 }
0x21b5   :  { %905 = vst [vmem:[#allocation16 + $0x2] sm:$0x1] %v904_v41 }
0x2217   :  { %v1602_v38 = vpop.xlane.xlu1 %1601 }
0x2218   :  { %1805 = vlog2.f32 %v1602_v38 }
0x221e   :  { %v1806_v26 = vpop.eup %1805 }
0x221f   :  { %v1604_v39 = vmul.f32 0.6931472, %v1806_v26 }
0x2221   :  { %v1605_v27 = vadd.f32 %v1604_v39, %v1596_v7 }
0x2223   :  { %v1606_v37 = vsub.f32 %v1592_v54, %v1605_v27 }
0x2225   :  { %1607 = vst [vmem:[#allocation16 + $0x5] sm:$0x1] %v1606_v37 }
0x2226   :  { %1621 = dma.vmem_to_hbm [thread:$0]  %s1617_s3, 128, %s1619_s6, [#allocation4]  }
0x2227   :  { %2087 = dma.done.wait [#allocation4], 128  }
0x2228   :  { %2088 = vsyncadd [#allocation4], 4294967168 }
0x2229   :  { %2089 = dma.done.wait [#allocation18], 256  }
0x222a   :  { %2090 = vsyncadd [#allocation18], 4294967040 }
0x222b   :  { %1656 = vsyncpa [#allocation3], 1 }
0x222c   :  { %1657 = vsyncpa [#allocation6], 1 }
0x222d   :  { %1658 = vsyncpa [#allocation9], 1 }
0x222e   :  { %1659 = vsyncpa [#allocation12], 1 }
0x222f   :  { %1660 = vsyncpa [#allocation15], 1 }
0x2230   :  { %1661 = vsyncpa [#allocation4], 1 }
0x2231   :  { %1662 = vsyncpa [#allocation18], 1 }

</bundles_post_ra>
